<compile_context>
chip_gen: v6e
topology: v6e:2x2x1
jax: 0.10.0
libtpu: 0.0.40
codegen_flags: <defaults>
</compile_context>

<pallas_src>
import functools

import jax
import jax.numpy as jnp
from jax.experimental import pallas as pl
from jax.experimental.pallas import tpu as pltpu

LN_EPS = 1e-5  # config.layer_norm_epsilon (GPT-2 default)


def _layer_norm(v, g, b):
    mu = jnp.mean(v, axis=-1, keepdims=True)
    var = jnp.mean(jnp.square(v - mu), axis=-1, keepdims=True)
    return (v - mu) * jax.lax.rsqrt(var + LN_EPS) * g + b


def gpt2_block_kernel(x_ref, amask_ref,
                      g1_ref, b1_ref,
                      wqkv_ref, bqkv_ref, wap_ref, bap_ref,
                      g2_ref, b2_ref,
                      wfc_ref, bfc_ref, wfp_ref, bfp_ref,
                      out_ref, *, n_head, mxu_dtype, flat_out):
    B, T, C = x_ref.shape
    H = n_head
    Dh = C // H
    M = B * T
    f32 = jnp.float32
    approx_recip = (mxu_dtype != jnp.float32)

    x = x_ref[...]                                                   # (B, T, C)

    # ------------------------------ ln_1 (f32) ------------------------------
    h1 = _layer_norm(x.reshape(M, C), g1_ref[...], b1_ref[...])      # (M, C)

    # -------------------- fused QKV projection (c_attn) ---------------------
    # ONE (M, C) @ (C, 3C) matmul; 1/sqrt(Dh) already folded into the Q
    # columns/bias on the host.  Columns are [q | k | v], head-major inside.
    qkv = jnp.dot(h1.astype(mxu_dtype), wqkv_ref[...],
                  preferred_element_type=f32) + bqkv_ref[...]        # (M, 3C) f32
    qkv_m = qkv.astype(mxu_dtype)   # single cast; per-head slices reuse it

    # Causal keep-mask + additive attention mask, built once and hoisted out of
    # the head loop.  No (B, H, T, T) bias tensor is ever materialized.
    row = jax.lax.broadcasted_iota(jnp.int32, (T, T), 0)
    col = jax.lax.broadcasted_iota(jnp.int32, (T, T), 1)
    keep = jnp.broadcast_to((col <= row)[None, :, :], (B, T, T))     # bool
    amask = jnp.broadcast_to(amask_ref[...][:, None, :], (B, T, T))  # (B, T, T)
    neg = jnp.float32(-10000.0)

    # ----------------------- attention core, per head -----------------------
    # Small static head loop; scores / P@V are B-batched matmuls.  c_proj is
    # contracted head-by-head into one (M, C) f32 accumulator.
    a_acc = jnp.zeros((M, C), f32)
    for h in range(H):
        q_h = qkv_m[:, h * Dh:(h + 1) * Dh].reshape(B, T, Dh)
        k_h = qkv_m[:, C + h * Dh:C + (h + 1) * Dh].reshape(B, T, Dh)
        v_h = qkv_m[:, 2 * C + h * Dh:2 * C + (h + 1) * Dh].reshape(B, T, Dh)

        s = jnp.einsum('btd,bsd->bts', q_h, k_h,
                       preferred_element_type=f32)                   # (B, T, T)
        # Reference semantics: masked scores are REPLACED by -10000, then the
        # additive attention mask is applied, then softmax (f32 math).
        s = jnp.where(keep, s, neg) + amask
        s = s - jnp.max(s, axis=-1, keepdims=True)
        e = jnp.exp(s)
        p = e * pl.reciprocal(jnp.sum(e, axis=-1, keepdims=True),
                              approx=approx_recip)

        attn_h = jnp.einsum('bts,bsd->btd', p.astype(mxu_dtype), v_h,
                            preferred_element_type=f32)              # (B, T, Dh)

        # c_proj rows for this head: (Dh, C).  MXU accumulation into a_acc.
        a_acc = a_acc + jnp.dot(attn_h.reshape(M, Dh).astype(mxu_dtype),
                                wap_ref[h], preferred_element_type=f32)

    a = (a_acc + bap_ref[...]).reshape(B, T, C)                      # (B, T, C)

    # NOTE: the reference Block applies `[0]` to the *tensor* returned by
    # Attention.forward, i.e. it selects batch element 0 and broadcasts it over
    # the batch in the residual add.  Reproduced exactly.
    hidden = a[0:1, :, :] + x                                        # (B, T, C)

    # ------------------------------ ln_2 + MLP ------------------------------
    h2 = _layer_norm(hidden.reshape(M, C), g2_ref[...], b2_ref[...])  # (M, C)
    fc = jnp.dot(h2.astype(mxu_dtype), wfc_ref[...],
                 preferred_element_type=f32) + bfc_ref[...]          # (M, 4C)
    act = jax.nn.gelu(fc, approximate=True)                          # 'gelu_new'
    mlp = jnp.dot(act.astype(mxu_dtype), wfp_ref[...],
                  preferred_element_type=f32) + bfp_ref[...]         # (M, C)

    out = hidden + mlp.reshape(B, T, C)                              # (B, T, C)
    if flat_out:
        # Lane-dense store when C < 128 (toy shapes): last dim T*C.
        out_ref[...] = out.reshape(B, T * C)
    else:
        out_ref[...] = out


def prepare_gpt2_block_params(params, n_head, mxu_dtype=jnp.bfloat16):
    """One-time host-side weight prep (hoisted out of the per-call path).

    Weights follow the GPT-2 Conv1D convention y = x @ W + b, W: (in, out).
    Folds 1/sqrt(Dh) into the Q columns of c_attn, reshapes c_proj per-head,
    and casts MXU operands to `mxu_dtype` (pass jnp.float32 for full-f32).
    """
    f32 = jnp.float32
    C = params['wqkv'].shape[0]
    H = n_head
    Dh = C // H
    scale = 1.0 / float(Dh) ** 0.5

    # Fold the score scale into the Q columns (first C output columns).
    col_scale = jnp.concatenate(
        [jnp.full((C,), scale, f32), jnp.ones((2 * C,), f32)])
    wqkv = params['wqkv'].astype(f32) * col_scale[None, :]
    bqkv = params['bqkv'].reshape(1, 3 * C).astype(f32) * col_scale[None, :]

    return dict(
        g1=params['g1'].reshape(1, C).astype(f32),
        b1=params['b1'].reshape(1, C).astype(f32),
        wqkv=wqkv.astype(mxu_dtype),                     # (C, 3C)
        bqkv=bqkv,                                       # (1, 3C) f32
        wap=params['wap'].reshape(H, Dh, C).astype(mxu_dtype),   # per-head rows
        bap=params['bap'].reshape(1, C).astype(f32),
        g2=params['g2'].reshape(1, C).astype(f32),
        b2=params['b2'].reshape(1, C).astype(f32),
        # TODO(synk): on v7x these two MLP weights could be fp8 for 2x MXU rate.
        wfc=params['wfc'].astype(mxu_dtype),             # (C, 4C)
        bfc=params['bfc'].reshape(1, -1).astype(f32),
        wfp=params['wfp'].astype(mxu_dtype),             # (4C, C)
        bfp=params['bfp'].reshape(1, C).astype(f32),
    )


def gpt2_block(x, attention_mask, prepared, n_head, *,
               vmem_limit_bytes=32 * 1024 * 1024):
    """Fused GPT-2 Block.

    x: (B, T, C) f32. attention_mask: additive GPT-2 mask of shape (B, 1, 1, T).
    `prepared` comes from prepare_gpt2_block_params (weights already permuted,
    scale-folded, and cast — no per-call weight prep / HBM round-trip).
    `vmem_limit_bytes` is a per-generation knob (v7x has half the VMEM).
    """
    B, T, C = x.shape
    f32 = jnp.float32
    mxu_dtype = prepared['wqkv'].dtype

    amask = attention_mask.reshape(B, T).astype(f32)
    p = prepared
    inputs = (x.astype(f32), amask, p['g1'], p['b1'], p['wqkv'], p['bqkv'],
              p['wap'], p['bap'], p['g2'], p['b2'], p['wfc'], p['bfc'],
              p['wfp'], p['bfp'])

    # Lane-dense (B, T*C) store only pays off when C itself is not a multiple
    # of 128 (toy shapes); real GPT-2 (C=768) stores (B, T, C) directly.
    flat_out = (C % 128) != 0
    out_shape = (jax.ShapeDtypeStruct((B, T * C), f32) if flat_out
                 else jax.ShapeDtypeStruct((B, T, C), f32))

    kernel = functools.partial(gpt2_block_kernel, n_head=n_head,
                               mxu_dtype=mxu_dtype, flat_out=flat_out)

    # Tiny shapes -> single grid point, everything resident in VMEM.
    # TODO(synk): for C>=768 / T>=1024 add a flash-style tiled grid
    # (parallel over batch*head and q tiles, arbitrary over KV tiles) with
    # generation-specific tile sizes and dimension_semantics.
    out = pl.pallas_call(
        kernel,
        out_shape=out_shape,
        in_specs=[pl.BlockSpec(memory_space=pltpu.MemorySpace.VMEM)] * len(inputs),
        out_specs=pl.BlockSpec(memory_space=pltpu.MemorySpace.VMEM),
        compiler_params=pltpu.CompilerParams(vmem_limit_bytes=vmem_limit_bytes),
    )(*inputs)
    return out.reshape(B, T, C) if flat_out else out


def _reference_block(x, attention_mask, p, n_head):
    """Pure-JAX mirror of the PyTorch forward (incl. the attn_outputs[0] quirk)."""
    B, T, C = x.shape
    Dh = C // n_head

    def ln(v, g, b):
        mu = v.mean(-1, keepdims=True)
        var = ((v - mu) ** 2).mean(-1, keepdims=True)
        return (v - mu) / jnp.sqrt(var + LN_EPS) * g.reshape(-1) + b.reshape(-1)

    h1 = ln(x, p['g1'], p['b1'])
    qkv = h1 @ p['wqkv'] + p['bqkv'].reshape(-1)
    q, k, v = jnp.split(qkv, 3, axis=-1)
    sh = lambda t: t.reshape(B, T, n_head, Dh).transpose(0, 2, 1, 3)
    q, k, v = sh(q), sh(k), sh(v)
    w = jnp.einsum('bhtd,bhsd->bhts', q, k) / jnp.sqrt(float(Dh))
    causal = jnp.tril(jnp.ones((T, T), bool))
    w = jnp.where(causal[None, None], w, -10000.0)
    w = w + attention_mask
    w = jax.nn.softmax(w, axis=-1)
    a = jnp.einsum('bhts,bhsd->bhtd', w, v).transpose(0, 2, 1, 3).reshape(B, T, C)
    a = a @ p['wap'] + p['bap'].reshape(-1)
    hidden = a[0] + x
    h2 = ln(hidden, p['g2'], p['b2'])
    fc = jax.nn.gelu(h2 @ p['wfc'] + p['bfc'].reshape(-1), approximate=True)
    mlp = fc @ p['wfp'] + p['bfp'].reshape(-1)
    return hidden + mlp


if __name__ == "__main__":
    # config: n_embd=32, n_head=4, n_ctx=8, n_inner=None -> inner_dim = 4*32
    B, T, C, H = 2, 8, 32, 4
    inner = 4 * C

    key = jax.random.PRNGKey(0)
    ks = jax.random.split(key, 12)
    std = 0.02
    params = dict(
        g1=1.0 + 0.1 * jax.random.normal(ks[5], (1, C), jnp.float32),
        b1=0.1 * jax.random.normal(ks[6], (1, C), jnp.float32),
        wqkv=std * jax.random.normal(ks[0], (C, 3 * C), jnp.float32),
        bqkv=std * jax.random.normal(ks[7], (1, 3 * C), jnp.float32),
        wap=std * jax.random.normal(ks[1], (C, C), jnp.float32),
        bap=std * jax.random.normal(ks[8], (1, C), jnp.float32),
        g2=1.0 + 0.1 * jax.random.normal(ks[9], (1, C), jnp.float32),
        b2=0.1 * jax.random.normal(ks[10], (1, C), jnp.float32),
        wfc=std * jax.random.normal(ks[2], (C, inner), jnp.float32),
        bfc=std * jax.random.normal(ks[11], (1, inner), jnp.float32),
        wfp=std * jax.random.normal(ks[3], (inner, C), jnp.float32),
        bfp=std * jax.random.normal(ks[3], (1, C), jnp.float32),
    )

    x = jax.random.normal(ks[4], (B, T, C), jnp.float32)
    # Additive attention mask (B,1,1,T): mask the last two key positions of batch 1.
    key_keep = jnp.ones((B, T), jnp.float32).at[1, -2:].set(0.0)
    attention_mask = ((1.0 - key_keep) * -10000.0).reshape(B, 1, 1, T)

    # One-time weight prep (hoisted out of the per-call path).
    prepared = prepare_gpt2_block_params(params, n_head=H, mxu_dtype=jnp.bfloat16)

    out = gpt2_block(x, attention_mask, prepared, n_head=H)   # bf16 MXU, f32 accum
    jax.block_until_ready(out)

    ref = _reference_block(x, attention_mask, params, H)
    max_err = float(jnp.max(jnp.abs(out - ref)))
    # bf16 MXU operands with f32 accumulation -> bf16-level tolerance vs f32 ref.
    assert jnp.allclose(out, ref, atol=2e-3, rtol=2e-3), f"max abs err {max_err}"

    print("KERNEL_OK")
</pallas_src>

<mosaic_0001>
module attributes {stable_mosaic.version = 11 : i64} {
  func.func @gpt2_block_kernel(%arg0: memref<2x8x32xf32, #tpu.memory_space<vmem>>, %arg1: memref<2x8xf32, #tpu.memory_space<vmem>>, %arg2: memref<1x32xf32, #tpu.memory_space<vmem>>, %arg3: memref<1x32xf32, #tpu.memory_space<vmem>>, %arg4: memref<32x96xbf16, #tpu.memory_space<vmem>>, %arg5: memref<1x96xf32, #tpu.memory_space<vmem>>, %arg6: memref<4x8x32xbf16, #tpu.memory_space<vmem>>, %arg7: memref<1x32xf32, #tpu.memory_space<vmem>>, %arg8: memref<1x32xf32, #tpu.memory_space<vmem>>, %arg9: memref<1x32xf32, #tpu.memory_space<vmem>>, %arg10: memref<32x128xbf16, #tpu.memory_space<vmem>>, %arg11: memref<1x128xf32, #tpu.memory_space<vmem>>, %arg12: memref<128x32xbf16, #tpu.memory_space<vmem>>, %arg13: memref<1x32xf32, #tpu.memory_space<vmem>>, %arg14: memref<2x256xf32, #tpu.memory_space<vmem>>) attributes {dimension_semantics = [], scalar_prefetch = 0 : i64, scratch_operands = 0 : i64, tpu.core_type = #tpu.core_type<tc>} {
    %c0 = arith.constant 0 : index
    %c0_0 = arith.constant 0 : index
    %c0_1 = arith.constant 0 : index
    %0 = vector.load %arg0[%c0, %c0_0, %c0_1] : memref<2x8x32xf32, #tpu.memory_space<vmem>>, vector<2x8x32xf32>
    %1 = vector.shape_cast %0 : vector<2x8x32xf32> to vector<16x32xf32>
    %c0_2 = arith.constant 0 : index
    %c0_3 = arith.constant 0 : index
    %2 = vector.load %arg2[%c0_2, %c0_3] : memref<1x32xf32, #tpu.memory_space<vmem>>, vector<1x32xf32>
    %c0_4 = arith.constant 0 : index
    %c0_5 = arith.constant 0 : index
    %3 = vector.load %arg3[%c0_4, %c0_5] : memref<1x32xf32, #tpu.memory_space<vmem>>, vector<1x32xf32>
    %cst = arith.constant dense<0.000000e+00> : vector<16xf32>
    %4 = vector.multi_reduction <add>, %1, %cst [1] : vector<16x32xf32> to vector<16xf32>
    %5 = vector.shape_cast %4 : vector<16xf32> to vector<16x1xf32>
    %cst_6 = arith.constant 3.200000e+01 : f32
    %6 = vector.broadcast %cst_6 : f32 to vector<16x1xf32>
    %7 = arith.divf %5, %6 : vector<16x1xf32>
    %8 = vector.broadcast %7 : vector<16x1xf32> to vector<16x32xf32>
    %9 = arith.subf %1, %8 : vector<16x32xf32>
    %10 = arith.mulf %9, %9 : vector<16x32xf32>
    %cst_7 = arith.constant dense<0.000000e+00> : vector<16xf32>
    %11 = vector.multi_reduction <add>, %10, %cst_7 [1] : vector<16x32xf32> to vector<16xf32>
    %12 = vector.shape_cast %11 : vector<16xf32> to vector<16x1xf32>
    %cst_8 = arith.constant 3.200000e+01 : f32
    %13 = vector.broadcast %cst_8 : f32 to vector<16x1xf32>
    %14 = arith.divf %12, %13 : vector<16x1xf32>
    %15 = vector.broadcast %7 : vector<16x1xf32> to vector<16x32xf32>
    %16 = arith.subf %1, %15 : vector<16x32xf32>
    %cst_9 = arith.constant 9.99999974E-6 : f32
    %17 = vector.broadcast %cst_9 : f32 to vector<16x1xf32>
    %18 = arith.addf %14, %17 : vector<16x1xf32>
    %19 = math.rsqrt %18 : vector<16x1xf32>
    %20 = vector.broadcast %19 : vector<16x1xf32> to vector<16x32xf32>
    %21 = arith.mulf %16, %20 : vector<16x32xf32>
    %22 = vector.broadcast %2 : vector<1x32xf32> to vector<16x32xf32>
    %23 = arith.mulf %21, %22 : vector<16x32xf32>
    %24 = vector.broadcast %3 : vector<1x32xf32> to vector<16x32xf32>
    %25 = arith.addf %23, %24 : vector<16x32xf32>
    %26 = arith.truncf %25 : vector<16x32xf32> to vector<16x32xbf16>
    %c0_10 = arith.constant 0 : index
    %c0_11 = arith.constant 0 : index
    %27 = vector.load %arg4[%c0_10, %c0_11] : memref<32x96xbf16, #tpu.memory_space<vmem>>, vector<32x96xbf16>
    %cst_12 = arith.constant dense<0.000000e+00> : vector<16x96xf32>
    %28 = tpu.matmul %26, %27, %cst_12 {dimension_numbers = #tpu.dot_dimension_numbers<[1], [0], [0], [1], [0, 0, 1, 1], [], []>} : vector<16x32xbf16>, vector<32x96xbf16>, vector<16x96xf32> -> vector<16x96xf32>
    %c0_13 = arith.constant 0 : index
    %c0_14 = arith.constant 0 : index
    %29 = vector.load %arg5[%c0_13, %c0_14] : memref<1x96xf32, #tpu.memory_space<vmem>>, vector<1x96xf32>
    %30 = vector.broadcast %29 : vector<1x96xf32> to vector<16x96xf32>
    %31 = arith.addf %28, %30 : vector<16x96xf32>
    %32 = arith.truncf %31 : vector<16x96xf32> to vector<16x96xbf16>
    %33 = tpu.iota {dimensions = array<i32: 0>} : vector<8x8xi32>
    %34 = tpu.iota {dimensions = array<i32: 1>} : vector<8x8xi32>
    %35 = arith.cmpi sle, %34, %33 : vector<8x8xi32>
    %36 = vector.shape_cast %35 : vector<8x8xi1> to vector<1x8x8xi1>
    %37 = vector.shape_cast %36 : vector<1x8x8xi1> to vector<1x8x8xi1>
    %38 = vector.broadcast %37 : vector<1x8x8xi1> to vector<2x8x8xi1>
    %c0_15 = arith.constant 0 : index
    %c0_16 = arith.constant 0 : index
    %39 = vector.load %arg1[%c0_15, %c0_16] : memref<2x8xf32, #tpu.memory_space<vmem>>, vector<2x8xf32>
    %40 = vector.shape_cast %39 : vector<2x8xf32> to vector<2x1x8xf32>
    %41 = vector.shape_cast %40 : vector<2x1x8xf32> to vector<2x1x8xf32>
    %42 = vector.broadcast %41 : vector<2x1x8xf32> to vector<2x8x8xf32>
    %cst_17 = arith.constant 0.000000e+00 : f32
    %43 = vector.broadcast %cst_17 : f32 to vector<16x32xf32>
    %44 = vector.extract_strided_slice %32 {offsets = [0, 0], sizes = [16, 8], strides = [1, 1]} : vector<16x96xbf16> to vector<16x8xbf16>
    %45 = vector.shape_cast %44 : vector<16x8xbf16> to vector<2x8x8xbf16>
    %46 = vector.extract_strided_slice %32 {offsets = [0, 32], sizes = [16, 8], strides = [1, 1]} : vector<16x96xbf16> to vector<16x8xbf16>
    %47 = vector.shape_cast %46 : vector<16x8xbf16> to vector<2x8x8xbf16>
    %48 = vector.extract_strided_slice %32 {offsets = [0, 64], sizes = [16, 8], strides = [1, 1]} : vector<16x96xbf16> to vector<16x8xbf16>
    %49 = vector.shape_cast %48 : vector<16x8xbf16> to vector<2x8x8xbf16>
    "tpu.trace_start"() <{level = 10 : i32, message = "btd,bsd->bts"}> : () -> ()
    %cst_18 = arith.constant dense<0.000000e+00> : vector<2x8x8xf32>
    %50 = tpu.matmul %45, %47, %cst_18 {dimension_numbers = #tpu.dot_dimension_numbers<[2], [2], [1], [1], [0, 0, 0, 1, 1, 1], [0], [0]>} : vector<2x8x8xbf16>, vector<2x8x8xbf16>, vector<2x8x8xf32> -> vector<2x8x8xf32>
    %cst_19 = arith.constant -1.000000e+04 : f32
    "tpu.trace_stop"() : () -> ()
    %51 = vector.broadcast %cst_19 : f32 to vector<2x8x8xf32>
    %52 = arith.select %38, %50, %51 : vector<2x8x8xi1>, vector<2x8x8xf32>
    %53 = arith.addf %52, %42 : vector<2x8x8xf32>
    %cst_20 = arith.constant dense<0xFF800000> : vector<2x8xf32>
    %54 = vector.multi_reduction <maximumf>, %53, %cst_20 [2] : vector<2x8x8xf32> to vector<2x8xf32>
    %55 = vector.shape_cast %54 : vector<2x8xf32> to vector<2x8x1xf32>
    %56 = vector.broadcast %55 : vector<2x8x1xf32> to vector<2x8x8xf32>
    %57 = arith.subf %53, %56 : vector<2x8x8xf32>
    %58 = math.exp %57 : vector<2x8x8xf32>
    %cst_21 = arith.constant dense<0.000000e+00> : vector<2x8xf32>
    %59 = vector.multi_reduction <add>, %58, %cst_21 [2] : vector<2x8x8xf32> to vector<2x8xf32>
    %60 = vector.shape_cast %59 : vector<2x8xf32> to vector<2x8x1xf32>
    %61 = tpu.reciprocal %60 {approx = true} : vector<2x8x1xf32> -> vector<2x8x1xf32>
    %62 = vector.broadcast %61 : vector<2x8x1xf32> to vector<2x8x8xf32>
    %63 = arith.mulf %58, %62 : vector<2x8x8xf32>
    %64 = arith.truncf %63 : vector<2x8x8xf32> to vector<2x8x8xbf16>
    "tpu.trace_start"() <{level = 10 : i32, message = "bts,bsd->btd"}> : () -> ()
    %cst_22 = arith.constant dense<0.000000e+00> : vector<2x8x8xf32>
    %65 = tpu.matmul %64, %49, %cst_22 {dimension_numbers = #tpu.dot_dimension_numbers<[2], [1], [1], [2], [0, 0, 0, 1, 1, 2], [0], [0]>} : vector<2x8x8xbf16>, vector<2x8x8xbf16>, vector<2x8x8xf32> -> vector<2x8x8xf32>
    "tpu.trace_stop"() : () -> ()
    %66 = vector.shape_cast %65 : vector<2x8x8xf32> to vector<16x8xf32>
    %67 = arith.truncf %66 : vector<16x8xf32> to vector<16x8xbf16>
    %c0_23 = arith.constant 0 : index
    %c0_24 = arith.constant 0 : index
    %c0_25 = arith.constant 0 : index
    %68 = vector.load %arg6[%c0_23, %c0_24, %c0_25] : memref<4x8x32xbf16, #tpu.memory_space<vmem>>, vector<1x8x32xbf16>
    %69 = vector.shape_cast %68 : vector<1x8x32xbf16> to vector<8x32xbf16>
    %cst_26 = arith.constant dense<0.000000e+00> : vector<16x32xf32>
    %70 = tpu.matmul %67, %69, %cst_26 {dimension_numbers = #tpu.dot_dimension_numbers<[1], [0], [0], [1], [0, 0, 1, 1], [], []>} : vector<16x8xbf16>, vector<8x32xbf16>, vector<16x32xf32> -> vector<16x32xf32>
    %71 = arith.addf %43, %70 : vector<16x32xf32>
    %72 = vector.extract_strided_slice %32 {offsets = [0, 8], sizes = [16, 8], strides = [1, 1]} : vector<16x96xbf16> to vector<16x8xbf16>
    %73 = vector.shape_cast %72 : vector<16x8xbf16> to vector<2x8x8xbf16>
    %74 = vector.extract_strided_slice %32 {offsets = [0, 40], sizes = [16, 8], strides = [1, 1]} : vector<16x96xbf16> to vector<16x8xbf16>
    %75 = vector.shape_cast %74 : vector<16x8xbf16> to vector<2x8x8xbf16>
    %76 = vector.extract_strided_slice %32 {offsets = [0, 72], sizes = [16, 8], strides = [1, 1]} : vector<16x96xbf16> to vector<16x8xbf16>
    %77 = vector.shape_cast %76 : vector<16x8xbf16> to vector<2x8x8xbf16>
    "tpu.trace_start"() <{level = 10 : i32, message = "btd,bsd->bts"}> : () -> ()
    %cst_27 = arith.constant dense<0.000000e+00> : vector<2x8x8xf32>
    %78 = tpu.matmul %73, %75, %cst_27 {dimension_numbers = #tpu.dot_dimension_numbers<[2], [2], [1], [1], [0, 0, 0, 1, 1, 1], [0], [0]>} : vector<2x8x8xbf16>, vector<2x8x8xbf16>, vector<2x8x8xf32> -> vector<2x8x8xf32>
    %cst_28 = arith.constant -1.000000e+04 : f32
    "tpu.trace_stop"() : () -> ()
    %79 = vector.broadcast %cst_28 : f32 to vector<2x8x8xf32>
    %80 = arith.select %38, %78, %79 : vector<2x8x8xi1>, vector<2x8x8xf32>
    %81 = arith.addf %80, %42 : vector<2x8x8xf32>
    %cst_29 = arith.constant dense<0xFF800000> : vector<2x8xf32>
    %82 = vector.multi_reduction <maximumf>, %81, %cst_29 [2] : vector<2x8x8xf32> to vector<2x8xf32>
    %83 = vector.shape_cast %82 : vector<2x8xf32> to vector<2x8x1xf32>
    %84 = vector.broadcast %83 : vector<2x8x1xf32> to vector<2x8x8xf32>
    %85 = arith.subf %81, %84 : vector<2x8x8xf32>
    %86 = math.exp %85 : vector<2x8x8xf32>
    %cst_30 = arith.constant dense<0.000000e+00> : vector<2x8xf32>
    %87 = vector.multi_reduction <add>, %86, %cst_30 [2] : vector<2x8x8xf32> to vector<2x8xf32>
    %88 = vector.shape_cast %87 : vector<2x8xf32> to vector<2x8x1xf32>
    %89 = tpu.reciprocal %88 {approx = true} : vector<2x8x1xf32> -> vector<2x8x1xf32>
    %90 = vector.broadcast %89 : vector<2x8x1xf32> to vector<2x8x8xf32>
    %91 = arith.mulf %86, %90 : vector<2x8x8xf32>
    %92 = arith.truncf %91 : vector<2x8x8xf32> to vector<2x8x8xbf16>
    "tpu.trace_start"() <{level = 10 : i32, message = "bts,bsd->btd"}> : () -> ()
    %cst_31 = arith.constant dense<0.000000e+00> : vector<2x8x8xf32>
    %93 = tpu.matmul %92, %77, %cst_31 {dimension_numbers = #tpu.dot_dimension_numbers<[2], [1], [1], [2], [0, 0, 0, 1, 1, 2], [0], [0]>} : vector<2x8x8xbf16>, vector<2x8x8xbf16>, vector<2x8x8xf32> -> vector<2x8x8xf32>
    "tpu.trace_stop"() : () -> ()
    %94 = vector.shape_cast %93 : vector<2x8x8xf32> to vector<16x8xf32>
    %95 = arith.truncf %94 : vector<16x8xf32> to vector<16x8xbf16>
    %c1 = arith.constant 1 : index
    %c0_32 = arith.constant 0 : index
    %c0_33 = arith.constant 0 : index
    %96 = vector.load %arg6[%c1, %c0_32, %c0_33] : memref<4x8x32xbf16, #tpu.memory_space<vmem>>, vector<1x8x32xbf16>
    %97 = vector.shape_cast %96 : vector<1x8x32xbf16> to vector<8x32xbf16>
    %cst_34 = arith.constant dense<0.000000e+00> : vector<16x32xf32>
    %98 = tpu.matmul %95, %97, %cst_34 {dimension_numbers = #tpu.dot_dimension_numbers<[1], [0], [0], [1], [0, 0, 1, 1], [], []>} : vector<16x8xbf16>, vector<8x32xbf16>, vector<16x32xf32> -> vector<16x32xf32>
    %99 = arith.addf %71, %98 : vector<16x32xf32>
    %100 = vector.extract_strided_slice %32 {offsets = [0, 16], sizes = [16, 8], strides = [1, 1]} : vector<16x96xbf16> to vector<16x8xbf16>
    %101 = vector.shape_cast %100 : vector<16x8xbf16> to vector<2x8x8xbf16>
    %102 = vector.extract_strided_slice %32 {offsets = [0, 48], sizes = [16, 8], strides = [1, 1]} : vector<16x96xbf16> to vector<16x8xbf16>
    %103 = vector.shape_cast %102 : vector<16x8xbf16> to vector<2x8x8xbf16>
    %104 = vector.extract_strided_slice %32 {offsets = [0, 80], sizes = [16, 8], strides = [1, 1]} : vector<16x96xbf16> to vector<16x8xbf16>
    %105 = vector.shape_cast %104 : vector<16x8xbf16> to vector<2x8x8xbf16>
    "tpu.trace_start"() <{level = 10 : i32, message = "btd,bsd->bts"}> : () -> ()
    %cst_35 = arith.constant dense<0.000000e+00> : vector<2x8x8xf32>
    %106 = tpu.matmul %101, %103, %cst_35 {dimension_numbers = #tpu.dot_dimension_numbers<[2], [2], [1], [1], [0, 0, 0, 1, 1, 1], [0], [0]>} : vector<2x8x8xbf16>, vector<2x8x8xbf16>, vector<2x8x8xf32> -> vector<2x8x8xf32>
    %cst_36 = arith.constant -1.000000e+04 : f32
    "tpu.trace_stop"() : () -> ()
    %107 = vector.broadcast %cst_36 : f32 to vector<2x8x8xf32>
    %108 = arith.select %38, %106, %107 : vector<2x8x8xi1>, vector<2x8x8xf32>
    %109 = arith.addf %108, %42 : vector<2x8x8xf32>
    %cst_37 = arith.constant dense<0xFF800000> : vector<2x8xf32>
    %110 = vector.multi_reduction <maximumf>, %109, %cst_37 [2] : vector<2x8x8xf32> to vector<2x8xf32>
    %111 = vector.shape_cast %110 : vector<2x8xf32> to vector<2x8x1xf32>
    %112 = vector.broadcast %111 : vector<2x8x1xf32> to vector<2x8x8xf32>
    %113 = arith.subf %109, %112 : vector<2x8x8xf32>
    %114 = math.exp %113 : vector<2x8x8xf32>
    %cst_38 = arith.constant dense<0.000000e+00> : vector<2x8xf32>
    %115 = vector.multi_reduction <add>, %114, %cst_38 [2] : vector<2x8x8xf32> to vector<2x8xf32>
    %116 = vector.shape_cast %115 : vector<2x8xf32> to vector<2x8x1xf32>
    %117 = tpu.reciprocal %116 {approx = true} : vector<2x8x1xf32> -> vector<2x8x1xf32>
    %118 = vector.broadcast %117 : vector<2x8x1xf32> to vector<2x8x8xf32>
    %119 = arith.mulf %114, %118 : vector<2x8x8xf32>
    %120 = arith.truncf %119 : vector<2x8x8xf32> to vector<2x8x8xbf16>
    "tpu.trace_start"() <{level = 10 : i32, message = "bts,bsd->btd"}> : () -> ()
    %cst_39 = arith.constant dense<0.000000e+00> : vector<2x8x8xf32>
    %121 = tpu.matmul %120, %105, %cst_39 {dimension_numbers = #tpu.dot_dimension_numbers<[2], [1], [1], [2], [0, 0, 0, 1, 1, 2], [0], [0]>} : vector<2x8x8xbf16>, vector<2x8x8xbf16>, vector<2x8x8xf32> -> vector<2x8x8xf32>
    "tpu.trace_stop"() : () -> ()
    %122 = vector.shape_cast %121 : vector<2x8x8xf32> to vector<16x8xf32>
    %123 = arith.truncf %122 : vector<16x8xf32> to vector<16x8xbf16>
    %c2 = arith.constant 2 : index
    %c0_40 = arith.constant 0 : index
    %c0_41 = arith.constant 0 : index
    %124 = vector.load %arg6[%c2, %c0_40, %c0_41] : memref<4x8x32xbf16, #tpu.memory_space<vmem>>, vector<1x8x32xbf16>
    %125 = vector.shape_cast %124 : vector<1x8x32xbf16> to vector<8x32xbf16>
    %cst_42 = arith.constant dense<0.000000e+00> : vector<16x32xf32>
    %126 = tpu.matmul %123, %125, %cst_42 {dimension_numbers = #tpu.dot_dimension_numbers<[1], [0], [0], [1], [0, 0, 1, 1], [], []>} : vector<16x8xbf16>, vector<8x32xbf16>, vector<16x32xf32> -> vector<16x32xf32>
    %127 = arith.addf %99, %126 : vector<16x32xf32>
    %128 = vector.extract_strided_slice %32 {offsets = [0, 24], sizes = [16, 8], strides = [1, 1]} : vector<16x96xbf16> to vector<16x8xbf16>
    %129 = vector.shape_cast %128 : vector<16x8xbf16> to vector<2x8x8xbf16>
    %130 = vector.extract_strided_slice %32 {offsets = [0, 56], sizes = [16, 8], strides = [1, 1]} : vector<16x96xbf16> to vector<16x8xbf16>
    %131 = vector.shape_cast %130 : vector<16x8xbf16> to vector<2x8x8xbf16>
    %132 = vector.extract_strided_slice %32 {offsets = [0, 88], sizes = [16, 8], strides = [1, 1]} : vector<16x96xbf16> to vector<16x8xbf16>
    %133 = vector.shape_cast %132 : vector<16x8xbf16> to vector<2x8x8xbf16>
    "tpu.trace_start"() <{level = 10 : i32, message = "btd,bsd->bts"}> : () -> ()
    %cst_43 = arith.constant dense<0.000000e+00> : vector<2x8x8xf32>
    %134 = tpu.matmul %129, %131, %cst_43 {dimension_numbers = #tpu.dot_dimension_numbers<[2], [2], [1], [1], [0, 0, 0, 1, 1, 1], [0], [0]>} : vector<2x8x8xbf16>, vector<2x8x8xbf16>, vector<2x8x8xf32> -> vector<2x8x8xf32>
    %cst_44 = arith.constant -1.000000e+04 : f32
    "tpu.trace_stop"() : () -> ()
    %135 = vector.broadcast %cst_44 : f32 to vector<2x8x8xf32>
    %136 = arith.select %38, %134, %135 : vector<2x8x8xi1>, vector<2x8x8xf32>
    %137 = arith.addf %136, %42 : vector<2x8x8xf32>
    %cst_45 = arith.constant dense<0xFF800000> : vector<2x8xf32>
    %138 = vector.multi_reduction <maximumf>, %137, %cst_45 [2] : vector<2x8x8xf32> to vector<2x8xf32>
    %139 = vector.shape_cast %138 : vector<2x8xf32> to vector<2x8x1xf32>
    %140 = vector.broadcast %139 : vector<2x8x1xf32> to vector<2x8x8xf32>
    %141 = arith.subf %137, %140 : vector<2x8x8xf32>
    %142 = math.exp %141 : vector<2x8x8xf32>
    %cst_46 = arith.constant dense<0.000000e+00> : vector<2x8xf32>
    %143 = vector.multi_reduction <add>, %142, %cst_46 [2] : vector<2x8x8xf32> to vector<2x8xf32>
    %144 = vector.shape_cast %143 : vector<2x8xf32> to vector<2x8x1xf32>
    %145 = tpu.reciprocal %144 {approx = true} : vector<2x8x1xf32> -> vector<2x8x1xf32>
    %146 = vector.broadcast %145 : vector<2x8x1xf32> to vector<2x8x8xf32>
    %147 = arith.mulf %142, %146 : vector<2x8x8xf32>
    %148 = arith.truncf %147 : vector<2x8x8xf32> to vector<2x8x8xbf16>
    "tpu.trace_start"() <{level = 10 : i32, message = "bts,bsd->btd"}> : () -> ()
    %cst_47 = arith.constant dense<0.000000e+00> : vector<2x8x8xf32>
    %149 = tpu.matmul %148, %133, %cst_47 {dimension_numbers = #tpu.dot_dimension_numbers<[2], [1], [1], [2], [0, 0, 0, 1, 1, 2], [0], [0]>} : vector<2x8x8xbf16>, vector<2x8x8xbf16>, vector<2x8x8xf32> -> vector<2x8x8xf32>
    "tpu.trace_stop"() : () -> ()
    %150 = vector.shape_cast %149 : vector<2x8x8xf32> to vector<16x8xf32>
    %151 = arith.truncf %150 : vector<16x8xf32> to vector<16x8xbf16>
    %c3 = arith.constant 3 : index
    %c0_48 = arith.constant 0 : index
    %c0_49 = arith.constant 0 : index
    %152 = vector.load %arg6[%c3, %c0_48, %c0_49] : memref<4x8x32xbf16, #tpu.memory_space<vmem>>, vector<1x8x32xbf16>
    %153 = vector.shape_cast %152 : vector<1x8x32xbf16> to vector<8x32xbf16>
    %cst_50 = arith.constant dense<0.000000e+00> : vector<16x32xf32>
    %154 = tpu.matmul %151, %153, %cst_50 {dimension_numbers = #tpu.dot_dimension_numbers<[1], [0], [0], [1], [0, 0, 1, 1], [], []>} : vector<16x8xbf16>, vector<8x32xbf16>, vector<16x32xf32> -> vector<16x32xf32>
    %155 = arith.addf %127, %154 : vector<16x32xf32>
    %c0_51 = arith.constant 0 : index
    %c0_52 = arith.constant 0 : index
    %156 = vector.load %arg7[%c0_51, %c0_52] : memref<1x32xf32, #tpu.memory_space<vmem>>, vector<1x32xf32>
    %157 = vector.broadcast %156 : vector<1x32xf32> to vector<16x32xf32>
    %158 = arith.addf %155, %157 : vector<16x32xf32>
    %159 = vector.shape_cast %158 : vector<16x32xf32> to vector<2x8x32xf32>
    %160 = vector.extract_strided_slice %159 {offsets = [0, 0, 0], sizes = [1, 8, 32], strides = [1, 1, 1]} : vector<2x8x32xf32> to vector<1x8x32xf32>
    %161 = vector.broadcast %160 : vector<1x8x32xf32> to vector<2x8x32xf32>
    %162 = arith.addf %161, %0 : vector<2x8x32xf32>
    %163 = vector.shape_cast %162 : vector<2x8x32xf32> to vector<16x32xf32>
    %c0_53 = arith.constant 0 : index
    %c0_54 = arith.constant 0 : index
    %164 = vector.load %arg8[%c0_53, %c0_54] : memref<1x32xf32, #tpu.memory_space<vmem>>, vector<1x32xf32>
    %c0_55 = arith.constant 0 : index
    %c0_56 = arith.constant 0 : index
    %165 = vector.load %arg9[%c0_55, %c0_56] : memref<1x32xf32, #tpu.memory_space<vmem>>, vector<1x32xf32>
    %cst_57 = arith.constant dense<0.000000e+00> : vector<16xf32>
    %166 = vector.multi_reduction <add>, %163, %cst_57 [1] : vector<16x32xf32> to vector<16xf32>
    %167 = vector.shape_cast %166 : vector<16xf32> to vector<16x1xf32>
    %cst_58 = arith.constant 3.200000e+01 : f32
    %168 = vector.broadcast %cst_58 : f32 to vector<16x1xf32>
    %169 = arith.divf %167, %168 : vector<16x1xf32>
    %170 = vector.broadcast %169 : vector<16x1xf32> to vector<16x32xf32>
    %171 = arith.subf %163, %170 : vector<16x32xf32>
    %172 = arith.mulf %171, %171 : vector<16x32xf32>
    %cst_59 = arith.constant dense<0.000000e+00> : vector<16xf32>
    %173 = vector.multi_reduction <add>, %172, %cst_59 [1] : vector<16x32xf32> to vector<16xf32>
    %174 = vector.shape_cast %173 : vector<16xf32> to vector<16x1xf32>
    %cst_60 = arith.constant 3.200000e+01 : f32
    %175 = vector.broadcast %cst_60 : f32 to vector<16x1xf32>
    %176 = arith.divf %174, %175 : vector<16x1xf32>
    %177 = vector.broadcast %169 : vector<16x1xf32> to vector<16x32xf32>
    %178 = arith.subf %163, %177 : vector<16x32xf32>
    %cst_61 = arith.constant 9.99999974E-6 : f32
    %179 = vector.broadcast %cst_61 : f32 to vector<16x1xf32>
    %180 = arith.addf %176, %179 : vector<16x1xf32>
    %181 = math.rsqrt %180 : vector<16x1xf32>
    %182 = vector.broadcast %181 : vector<16x1xf32> to vector<16x32xf32>
    %183 = arith.mulf %178, %182 : vector<16x32xf32>
    %184 = vector.broadcast %164 : vector<1x32xf32> to vector<16x32xf32>
    %185 = arith.mulf %183, %184 : vector<16x32xf32>
    %186 = vector.broadcast %165 : vector<1x32xf32> to vector<16x32xf32>
    %187 = arith.addf %185, %186 : vector<16x32xf32>
    %188 = arith.truncf %187 : vector<16x32xf32> to vector<16x32xbf16>
    %c0_62 = arith.constant 0 : index
    %c0_63 = arith.constant 0 : index
    %189 = vector.load %arg10[%c0_62, %c0_63] : memref<32x128xbf16, #tpu.memory_space<vmem>>, vector<32x128xbf16>
    %cst_64 = arith.constant dense<0.000000e+00> : vector<16x128xf32>
    %190 = tpu.matmul %188, %189, %cst_64 {dimension_numbers = #tpu.dot_dimension_numbers<[1], [0], [0], [1], [0, 0, 1, 1], [], []>} : vector<16x32xbf16>, vector<32x128xbf16>, vector<16x128xf32> -> vector<16x128xf32>
    %c0_65 = arith.constant 0 : index
    %c0_66 = arith.constant 0 : index
    %191 = vector.load %arg11[%c0_65, %c0_66] : memref<1x128xf32, #tpu.memory_space<vmem>>, vector<1x128xf32>
    %192 = vector.broadcast %191 : vector<1x128xf32> to vector<16x128xf32>
    %193 = arith.addf %190, %192 : vector<16x128xf32>
    %194 = arith.mulf %193, %193 : vector<16x128xf32>
    %195 = arith.mulf %193, %194 : vector<16x128xf32>
    %cst_67 = arith.constant 4.471500e-02 : f32
    %196 = vector.broadcast %cst_67 : f32 to vector<16x128xf32>
    %197 = arith.mulf %196, %195 : vector<16x128xf32>
    %198 = arith.addf %193, %197 : vector<16x128xf32>
    %cst_68 = arith.constant 0.797884583 : f32
    %199 = vector.broadcast %cst_68 : f32 to vector<16x128xf32>
    %200 = arith.mulf %199, %198 : vector<16x128xf32>
    %201 = math.tanh %200 : vector<16x128xf32>
    %cst_69 = arith.constant 1.000000e+00 : f32
    %202 = vector.broadcast %cst_69 : f32 to vector<16x128xf32>
    %203 = arith.addf %202, %201 : vector<16x128xf32>
    %cst_70 = arith.constant 5.000000e-01 : f32
    %204 = vector.broadcast %cst_70 : f32 to vector<16x128xf32>
    %205 = arith.mulf %204, %203 : vector<16x128xf32>
    %206 = arith.mulf %193, %205 : vector<16x128xf32>
    %207 = arith.truncf %206 : vector<16x128xf32> to vector<16x128xbf16>
    %c0_71 = arith.constant 0 : index
    %c0_72 = arith.constant 0 : index
    %208 = vector.load %arg12[%c0_71, %c0_72] : memref<128x32xbf16, #tpu.memory_space<vmem>>, vector<128x32xbf16>
    %cst_73 = arith.constant dense<0.000000e+00> : vector<16x32xf32>
    %209 = tpu.matmul %207, %208, %cst_73 {dimension_numbers = #tpu.dot_dimension_numbers<[1], [0], [0], [1], [0, 0, 1, 1], [], []>} : vector<16x128xbf16>, vector<128x32xbf16>, vector<16x32xf32> -> vector<16x32xf32>
    %c0_74 = arith.constant 0 : index
    %c0_75 = arith.constant 0 : index
    %210 = vector.load %arg13[%c0_74, %c0_75] : memref<1x32xf32, #tpu.memory_space<vmem>>, vector<1x32xf32>
    %211 = vector.broadcast %210 : vector<1x32xf32> to vector<16x32xf32>
    %212 = arith.addf %209, %211 : vector<16x32xf32>
    %213 = vector.shape_cast %212 : vector<16x32xf32> to vector<2x8x32xf32>
    %214 = arith.addf %162, %213 : vector<2x8x32xf32>
    %215 = vector.shape_cast %214 : vector<2x8x32xf32> to vector<2x256xf32>
    %c0_76 = arith.constant 0 : index
    %c0_77 = arith.constant 0 : index
    %216 = vector.load %arg14[%c0_76, %c0_77] : memref<2x256xf32, #tpu.memory_space<vmem>>, vector<2x256xf32>
    tpu.vector_store %arg14[%c0_76, %c0_77], %215 {strides = array<i32>} : memref<2x256xf32, #tpu.memory_space<vmem>>, vector<2x256xf32>,
    return
  }
}

</mosaic_0001>

<bundles_post_ra>
// kernel: tpu_custom_call.1
= control target key start
LH: loop header
LB: loop body
LE: loop exit
PB: predicated region body
PF: predicated region fallthrough
CT: control target
= control target key end

     0   :  { %vm53_vm0 = vcmask 261120   ;;  %s2483_s0 = inlined_call_operand.vmem [shape: f32[2,8,32], index: 0, kind: input, shape index: {}]   ;;  %s2484_s1 = inlined_call_operand.vmem [shape: f32[2,8], index: 1, kind: input, shape index: {}]   ;;  %s2485_s2 = inlined_call_operand.vmem [shape: f32[1,32], index: 2, kind: input, shape index: {}]   ;;  %s2486_s3 = inlined_call_operand.vmem [shape: f32[1,32], index: 3, kind: input, shape index: {}]   ;;  %s2487_s4 = inlined_call_operand.vmem [shape: bf16[32,96], index: 4, kind: input, shape index: {}]   ;;  %s2488_s5 = inlined_call_operand.vmem [shape: f32[1,96], index: 5, kind: input, shape index: {}]   ;;  %s2489_s6 = inlined_call_operand.vmem [shape: bf16[4,8,32], index: 6, kind: input, shape index: {}]   ;;  %s2490_s7 = inlined_call_operand.vmem [shape: f32[1,32], index: 7, kind: input, shape index: {}]   ;;  %s2491_s8 = inlined_call_operand.vmem [shape: f32[1,32], index: 8, kind: input, shape index: {}]   ;;  %s2492_s9 = inlined_call_operand.vmem [shape: f32[1,32], index: 9, kind: input, shape index: {}]   ;;  %s2493_s10 = inlined_call_operand.vmem [shape: bf16[32,128], index: 10, kind: input, shape index: {}]   ;;  %s2494_s11 = inlined_call_operand.vmem [shape: f32[1,128], index: 11, kind: input, shape index: {}]   ;;  %s2495_s12 = inlined_call_operand.vmem [shape: bf16[128,32], index: 12, kind: input, shape index: {}]   ;;  %s2496_s13 = inlined_call_operand.vmem [shape: f32[1,32], index: 13, kind: input, shape index: {}]   ;;  %s2497_s14 = inlined_call_operand.hbm [shape: f32[2,256], index: 14, kind: output, shape index: {}]  }
   0x1   :  { %v2136_v0 = vld [vmem:[%s2483_s0] sm:$0xff]  ;;  %v2141_v1 = vld [vmem:[%s2483_s0 + $0x8] sm:$0xff] }
   0x2   :  { %v54_v2 = vsel %vm53_vm0, %v2136_v0, 0.0  ;;  %v57_v3 = vsel %vm53_vm0, %v2141_v1, 0.0 }
   0x3   :  { %55 = vadd.xlane.f32.xlu0 %v54_v2 }
   0x7   :  { %58 = vadd.xlane.f32.xlu0 %v57_v3 }
   0x8   :  { %19 = vsyncpa [#allocation3], 0  ;;  %v1962_v14 = vld [vmem:[%s2487_s4 + $0x8] sm:$0xff]   ;;  %v2040_v15 = vmov 0.0   ;;  %vm2041_vm1 = vmmov 0   ;;  %v1963_v16 = vld [vmem:[%s2487_s4] sm:$0xff]   ;;  %v166_v47 = vlaneseq }
   0x9   :  { %1788 = vmatprep.subr.bf16.mxu1 %v2040_v15  ;;  %1792 = vmatprep.mubr.msk.bf16.mxu1 %vm2041_vm1, %v2040_v15  ;;  %v1682_v25 = vld [vmem:[%s2485_s2] ss:$0 sm:$0xff]  ;;  %s2042_s2 = smov 96   ;;  %vm214_vm2 = vcmask 64512   ;;  %v2043_v48 = vmov 1966171168  }
   0xa   :  { %1789 = vmatpush3.bf16.msra.mxu1 %v1962_v14  ;;  %1814 = vmatprep.subr.bf16.mxu0 %v2040_v15  ;;  %v1683_v29 = vld [vmem:[%s2486_s3] ss:$0 sm:$0xff]  ;;  %v184_v49 = vunpack.c.l.s4 %v2043_v48  ;;  %v2197_v50 = vshrl.u32 %v166_v47, 7  ;;  %v169_v54 = vand.u32 127, %v166_v47  ;;  %s2045_s25 = smov 88   ;;  %vm342_vm4 = vcmask 1043456  }
   0xb   :  { %1790 = vmatprep.subr.bf16.mxu1 %v2040_v15  ;;  %1816 = vmatprep.mubr.msk.bf16.mxu0 %vm2041_vm1, %v2040_v15  ;;  %v1684_v34 = vld [vmem:[%s2488_s5] ss:$0 sm:$0xff]  ;;  %s2046_s26 = smov 120   ;;  %s2047_s27 = smov 56   ;;  %vm1649_vm5 = vcmask 523264   ;;  %vm1651_vm6 = vcmask 785408  }
   0xc   :  { %v185_v51 = vunpack.c.0.s8 %v184_v49  ;;  %v1688_v53 = vld.sshfl [vmem:[%s2484_s1] sm:$0x11 pattern:$0x75316420]  ;;  %v199_v56 = vsub.s32 0, %v2197_v50  ;;  %vm2205_vm3 = vcmp.le.s32.totalorder %v169_v54, %v2197_v50  ;;  %s2044_s1 = smov 64  }
   0xd   :  { %v182_v59 = vcombine.high %v1688_v53, %v1688_v53  ;;  %s2048_s28 = smov 80   ;;  %s2049_s29 = smov 112  }
   0xe   :  { %1791 = vmatpush3.bf16.msra.mxu1 %v1963_v16  ;;  %v188_v52 = vsub.s32 %v185_v51, %v2197_v50  ;;  %s2050_s17 = smov 48   ;;  %s2051_s18 = smov 72  }
   0xf   :  { %1796 = vmatprep.subr.bf16.mxu1 %v2040_v15  ;;  %s2052_s19 = smov 104   ;;  %s2053_s21 = smov 40  }
  0x10   :  { %v189_v55 = vrot.slane %v1688_v53, %v188_v52  ;;  %v196_v2 = vrot.slane %v182_v59, %v188_v52 }
  0x12   :  { %v2209_v58 = vrot.slane %v189_v55, %v199_v56 }
  0x8c   :  { %v56_v4 = vpop.xlane.xlu0 %55 }
  0x8d   :  { %v61_v5 = vmul.f32 0.03125, %v56_v4 }
  0x8f   :  { %v63_v6 = vsub.f32 %v2136_v0, %v61_v5 }
  0x90   :  { %v59_v7 = vpop.xlane.xlu0 %58 }
  0x91   :  { %v62_v8 = vmul.f32 0.03125, %v59_v7  ;;  %v65_v9 = vmul.f32 %v63_v6, %v63_v6 }
  0x93   :  { %v64_v10 = vsub.f32 %v2141_v1, %v62_v8  ;;  %v67_v11 = vsel %vm53_vm0, %v65_v9, 0.0 }
  0x94   :  { %68 = vadd.xlane.f32.xlu1 %v67_v11 }
  0x95   :  { %v66_v12 = vmul.f32 %v64_v10, %v64_v10 }
  0x97   :  { %v70_v13 = vsel %vm53_vm0, %v66_v12, 0.0 }
  0x98   :  { %71 = vadd.xlane.f32.xlu1 %v70_v13 }
 0x11d   :  { %v69_v17 = vpop.xlane.xlu1 %68 }
 0x11e   :  { %v73_v18 = vmul.f32 0.03125, %v69_v17 }
 0x120   :  { %v75_v19 = vadd.f32 1e-05, %v73_v18 }
 0x121   :  { %v72_v20 = vpop.xlane.xlu1 %71 }
 0x122   :  { %1974 = vrsqrt.f32 %v75_v19  ;;  %v74_v21 = vmul.f32 0.03125, %v72_v20 }
 0x124   :  { %v76_v22 = vadd.f32 1e-05, %v74_v21 }
 0x126   :  { %1976 = vrsqrt.f32 %v76_v22 }
 0x12f   :  { %v1975_v23 = vpop.eup %1974 }
 0x130   :  { %v79_v24 = vmul.f32 %v1975_v23, %v63_v6  ;;  %v2215_v6 = vrot.slane %v196_v2, %v199_v56 }
 0x132   :  { %v87_v28 = vmul.f32 %v1682_v25, %v79_v24 }
 0x133   :  { %v1977_v26 = vpop.eup %1976 }
 0x134   :  { %v80_v27 = vmul.f32 %v1977_v26, %v64_v10  ;;  %v95_v31 = vadd.f32 %v1683_v29, %v87_v28 }
 0x136   :  { %v88_v30 = vmul.f32 %v1682_v25, %v80_v27 }
 0x138   :  { %v96_v32 = vadd.f32 %v1683_v29, %v88_v30 }
 0x13a   :  { %v97_v33 = vpack.c.bf16 %v96_v32, %v95_v31 }
 0x13c   :  { %1793 = vmatmul.mubr.msk.bf16.vlgmr.msra.gmra.mxu1 %vm53_vm0, %v97_v33 }
 0x13d   :  { %1798 = vmatprep.mubr.msk.bf16.mxu1 %vm2041_vm1, %v2040_v15 }
 0x1fc   :  { %v158_v35 = vpop.f32.mrf.mxu1 }
 0x1fd   :  { %v159_v36 = vadd.f32 %v1684_v34, %v158_v35 }
 0x1fe   :  { %v1794_v37 = vpop.f32.mrf.mxu1 }
 0x1ff   :  { %v2177_v38 = vpack.c.bf16 %v159_v36, %v159_v36 }
 0x200   :  { %v161_v39 = vpop.f32.mrf.mxu1 }
 0x201   :  { %v162_v40 = vadd.f32 %v1684_v34, %v161_v39  ;;  %212 = vrot.lane.b32.xlu0 %v2177_v38, %s2042_s2 }
 0x202   :  { %v1795_v41 = vpop.f32.mrf.mxu1 }
 0x203   :  { %v2181_v42 = vpack.c.bf16 %v162_v40, %v162_v40 }
 0x205   :  { %261 = vrot.lane.b32.xlu1 %v2181_v42, %s2042_s2 }
 0x273   :  { %v213_v43 = vpop.permute.xlu0 %212 }
 0x274   :  { %v219_v44 = vsel %vm214_vm2, %v213_v43, 0 }
 0x275   :  { %1797 = vmatpush3.bf16.xpose.msra.mxu1 %v219_v44 }
 0x276   :  { %1802 = vmatprep.subr.bf16.mxu1 %v2040_v15 }
 0x277   :  { %v262_v45 = vpop.permute.xlu1 %261 }
 0x278   :  { %v267_v46 = vsel %vm214_vm2, %v262_v45, 0 }
 0x27c   :  { %1799 = vmatmul.mubr.msk.bf16.vlgmr.msra.gmra.mxu1 %vm214_vm2, %v2177_v38 }
 0x27d   :  { %1803 = vmatpush3.bf16.xpose.msra.mxu1 %v267_v46  ;;  %1804 = vmatprep.mubr.msk.bf16.mxu1 %vm2041_vm1, %v2040_v15 }
 0x27e   :  { %1808 = vmatprep.subr.bf16.mxu1 %v2040_v15 }
 0x284   :  { %1805 = vmatmul.mubr.msk.bf16.vlgmr.msra.gmra.mxu1 %vm214_vm2, %v2181_v42 }
 0x285   :  { %1810 = vmatprep.mubr.msk.bf16.mxu1 %vm2041_vm1, %v2040_v15 }
 0x33c   :  { %v255_v60 = vpop.f32.mrf.mxu1 }
 0x33d   :  { %v309_v61 = vsel %vm2205_vm3, %v255_v60, -10000.0 }
 0x33e   :  { %v311_v62 = vadd.f32 %v309_v61, %v2209_v58  ;;  %v1800_v63 = vpop.f32.mrf.mxu1 }
 0x340   :  { %v258_v3 = vpop.f32.mrf.mxu1  ;;  %v313_v4 = vsel %vm214_vm2, %v311_v62, -inf }
 0x341   :  { %314 = vmax.xlane.f32.xlu1 %v313_v4 }
 0x342   :  { %v1801_v5 = vpop.f32.mrf.mxu1 }
 0x344   :  { %v303_v7 = vpop.f32.mrf.mxu1 }
 0x345   :  { %v310_v8 = vsel %vm2205_vm3, %v303_v7, -10000.0 }
 0x346   :  { %v312_v9 = vadd.f32 %v310_v8, %v2215_v6  ;;  %v1806_v10 = vpop.f32.mrf.mxu1 }
 0x348   :  { %v306_v11 = vpop.f32.mrf.mxu1  ;;  %v316_v12 = vsel %vm214_vm2, %v312_v9, -inf }
 0x349   :  { %317 = vmax.xlane.f32.xlu0 %v316_v12 }
 0x34a   :  { %v1807_v13 = vpop.f32.mrf.mxu1 }
 0x352   :  { %386 = vrot.lane.b32.xlu1 %v2181_v42, %s2044_s1 }
 0x356   :  { %438 = vrot.lane.b32.xlu1 %v2177_v38, %s2045_s25 }
 0x3ca   :  { %v315_v14 = vpop.xlane.xlu1 %314 }
 0x3cb   :  { %v319_v16 = vsub.f32 %v311_v62, %v315_v14 }
 0x3cd   :  { %v321_v17 = vmul.f32 1.442695, %v319_v16 }
 0x3ce   :  { %v387_v18 = vpop.permute.xlu1 %386 }
 0x3cf   :  { %1978 = vpow2.f32 %v321_v17  ;;  %v392_v19 = vsel %vm342_vm4, %v387_v18, 0 }
 0x3d0   :  { %1815 = vmatpush3.bf16.msra.mxu0 %v392_v19 }
 0x3d1   :  { %1826 = vmatprep.subr.bf16.mxu0 %v2040_v15 }
 0x3d2   :  { %v318_v20 = vpop.xlane.xlu0 %317  ;;  %v439_v28 = vpop.permute.xlu1 %438 }
 0x3d3   :  { %v320_v21 = vsub.f32 %v312_v9, %v318_v20  ;;  %v444_v35 = vsel %vm214_vm2, %v439_v28, 0 }
 0x3d5   :  { %v323_v22 = vmul.f32 1.442695, %v320_v21 }
 0x3d7   :  { %1980 = vpow2.f32 %v323_v22 }
 0x3dc   :  { %v1979_v23 = vpop.eup %1978 }
 0x3dd   :  { %v325_v24 = vsel %vm214_vm2, %v1979_v23, 0.0 }
 0x3de   :  { %326 = vadd.xlane.f32.xlu0 %v325_v24 }
 0x3e4   :  { %v1981_v25 = vpop.eup %1980 }
 0x3e5   :  { %v328_v26 = vsel %vm214_vm2, %v1981_v25, 0.0 }
 0x3e6   :  { %329 = vadd.xlane.f32.xlu1 %v328_v26 }
 0x3f4   :  { %337 = vrot.lane.b32.xlu0 %v2177_v38, %s2044_s1 }
 0x3f7   :  { %488 = vrot.lane.b32.xlu1 %v2181_v42, %s2045_s25 }
 0x3f8   :  { %436 = vrot.lane.b32.xlu0 %v2177_v38, %s2046_s26 }
 0x3fb   :  { %486 = vrot.lane.b32.xlu1 %v2181_v42, %s2046_s26 }
 0x467   :  { %v327_v27 = vpop.xlane.xlu0 %326 }
 0x468   :  { %1982 = vrcp.f32 %v327_v27 }
 0x46b   :  { %v338_v29 = vpop.permute.xlu0 %337 }
 0x46c   :  { %v344_v30 = vsel %vm342_vm4, %v338_v29, 0 }
 0x46d   :  { %1809 = vmatpush3.bf16.msra.mxu1 %v344_v30 }
 0x46e   :  { %1820 = vmatprep.subr.bf16.mxu1 %v2040_v15 }
 0x46f   :  { %v330_v31 = vpop.xlane.xlu1 %329  ;;  %v437_v41 = vpop.permute.xlu0 %436 }
 0x470   :  { %1984 = vrcp.f32 %v330_v31  ;;  %v435_v31 = vld [vmem:[%s2489_s6] sm:$0xf] }
 0x473   :  { %v489_v39 = vpop.permute.xlu1 %488 }
 0x474   :  { %v494_v43 = vsel %vm214_vm2, %v489_v39, 0 }
 0x475   :  { %v1983_v32 = vpop.eup %1982 }
 0x476   :  { %v333_v33 = vmul.f32 %v1983_v32, %v1979_v23 }
 0x477   :  { %v487_v44 = vpop.permute.xlu1 %486 }
 0x478   :  { %v335_v34 = vpack.c.bf16 %v333_v33, %v333_v33 }
 0x47a   :  { %1811 = vmatmul.mubr.msk.bf16.vlgmr.msra.gmra.mxu1 %vm214_vm2, %v335_v34  ;;  %v713_v34 = vsel %vm342_vm4, %v435_v31, 0 }
 0x47b   :  { %1821 = vmatpush3.bf16.xpose.msra.mxu1 %v444_v35  ;;  %1822 = vmatprep.mubr.msk.bf16.mxu1 %vm2041_vm1, %v2040_v15 }
 0x47c   :  { %1832 = vmatprep.subr.bf16.mxu1 %v2040_v15 }
 0x47d   :  { %v1985_v36 = vpop.eup %1984 }
 0x47e   :  { %v334_v37 = vmul.f32 %v1985_v36, %v1981_v25 }
 0x480   :  { %v336_v40 = vpack.c.bf16 %v334_v37, %v334_v37 }
 0x482   :  { %1817 = vmatmul.mubr.msk.bf16.vlgmr.msra.gmra.mxu0 %vm214_vm2, %v336_v40  ;;  %1823 = vmatmul.mubr.msk.bf16.vlgmr.msra.gmra.mxu1 %vm214_vm2, %v437_v41  ;;  %v1699_v40 = vld [vmem:[%s2489_s6 + $0x4] sm:$0xf] }
 0x483   :  { %1827 = vmatpush3.bf16.xpose.msra.mxu0 %v494_v43  ;;  %1828 = vmatprep.mubr.msk.bf16.mxu0 %vm2041_vm1, %v2040_v15  ;;  %v667_v41 = vsel %vm342_vm4, %v1699_v40, 0 }
 0x484   :  { %1838 = vmatprep.subr.bf16.mxu0 %v2040_v15  ;;  %1834 = vmatprep.mubr.msk.bf16.mxu1 %vm2041_vm1, %v2040_v15 }
 0x48a   :  { %1829 = vmatmul.mubr.msk.bf16.vlgmr.msra.gmra.mxu0 %vm214_vm2, %v487_v44 }
 0x48b   :  { %1840 = vmatprep.mubr.msk.bf16.mxu0 %vm2041_vm1, %v2040_v15 }
 0x53a   :  { %v2251_v45 = vpop.f32.mrf.mxu1 }
 0x53c   :  { %v1812_v46 = vpop.f32.mrf.mxu1 }
 0x53e   :  { %v383_v47 = vpop.f32.mrf.mxu1 }
 0x540   :  { %v1813_v48 = vpop.f32.mrf.mxu1 }
 0x542   :  { %v2253_v49 = vpop.f32.mrf.mxu0  ;;  %v480_v51 = vpop.f32.mrf.mxu1 }
 0x543   :  { %v434_v52 = vpack.c.bf16 %v2253_v49, %v2251_v45  ;;  %v536_v53 = vsel %vm2205_vm3, %v480_v51, -10000.0 }
 0x544   :  { %v538_v54 = vadd.f32 %v536_v53, %v2209_v58  ;;  %v1818_v55 = vpop.f32.mrf.mxu0  ;;  %v1824_v56 = vpop.f32.mrf.mxu1 }
 0x546   :  { %v431_v59 = vpop.f32.mrf.mxu0  ;;  %v483_v60 = vpop.f32.mrf.mxu1  ;;  %v540_v61 = vsel %vm214_vm2, %v538_v54, -inf }
 0x547   :  { %541 = vmax.xlane.f32.xlu0 %v540_v61 }
 0x548   :  { %v1819_v62 = vpop.f32.mrf.mxu0  ;;  %v1825_v63 = vpop.f32.mrf.mxu1 }
 0x54a   :  { %v530_v2 = vpop.f32.mrf.mxu0 }
 0x54b   :  { %v537_v3 = vsel %vm2205_vm3, %v530_v2, -10000.0 }
 0x54c   :  { %v539_v4 = vadd.f32 %v537_v3, %v2215_v6  ;;  %v1830_v5 = vpop.f32.mrf.mxu0 }
 0x54e   :  { %v533_v7 = vpop.f32.mrf.mxu0  ;;  %v543_v8 = vsel %vm214_vm2, %v539_v4, -inf }
 0x54f   :  { %544 = vmax.xlane.f32.xlu1 %v543_v8 }
 0x550   :  { %v1831_v9 = vpop.f32.mrf.mxu0 }
 0x560   :  { %612 = vrot.lane.b32.xlu1 %v2181_v42, %s2047_s27 }
 0x564   :  { %757 = vrot.lane.b32.xlu1 %v2177_v38, %s2048_s28 }
 0x568   :  { %807 = vrot.lane.b32.xlu1 %v2181_v42, %s2048_s28 }
 0x56c   :  { %805 = vrot.lane.b32.xlu1 %v2181_v42, %s2049_s29 }
 0x5d0   :  { %v542_v10 = vpop.xlane.xlu0 %541 }
 0x5d1   :  { %v546_v11 = vsub.f32 %v538_v54, %v542_v10 }
 0x5d3   :  { %v548_v12 = vmul.f32 1.442695, %v546_v11 }
 0x5d5   :  { %1986 = vpow2.f32 %v548_v12 }
 0x5d8   :  { %v545_v13 = vpop.xlane.xlu1 %544 }
 0x5d9   :  { %v547_v14 = vsub.f32 %v539_v4, %v545_v13 }
 0x5db   :  { %v550_v16 = vmul.f32 1.442695, %v547_v14 }
 0x5dc   :  { %v613_v17 = vpop.permute.xlu1 %612 }
 0x5dd   :  { %1988 = vpow2.f32 %v550_v16  ;;  %v618_v18 = vsel %vm342_vm4, %v613_v17, 0 }
 0x5de   :  { %1839 = vmatpush3.bf16.msra.mxu0 %v618_v18 }
 0x5df   :  { %1850 = vmatprep.subr.bf16.mxu0 %v2040_v15 }
 0x5e0   :  { %v758_v35 = vpop.permute.xlu1 %757 }
 0x5e1   :  { %v763_v51 = vsel %vm214_vm2, %v758_v35, 0 }
 0x5e2   :  { %v1987_v19 = vpop.eup %1986 }
 0x5e3   :  { %v552_v20 = vsel %vm214_vm2, %v1987_v19, 0.0 }
 0x5e4   :  { %553 = vadd.xlane.f32.xlu0 %v552_v20  ;;  %v808_v36 = vpop.permute.xlu1 %807 }
 0x5e5   :  { %v813_v37 = vsel %vm214_vm2, %v808_v36, 0 }
 0x5e8   :  { %v806_v39 = vpop.permute.xlu1 %805 }
 0x5ea   :  { %v1989_v21 = vpop.eup %1988 }
 0x5eb   :  { %v555_v22 = vsel %vm214_vm2, %v1989_v21, 0.0 }
 0x5ec   :  { %556 = vadd.xlane.f32.xlu0 %v555_v22 }
 0x602   :  { %564 = vrot.lane.b32.xlu0 %v2177_v38, %s2047_s27 }
 0x606   :  { %755 = vrot.lane.b32.xlu0 %v2177_v38, %s2049_s29 }
 0x66d   :  { %v554_v23 = vpop.xlane.xlu0 %553 }
 0x66e   :  { %1990 = vrcp.f32 %v554_v23 }
 0x675   :  { %v557_v24 = vpop.xlane.xlu0 %556 }
 0x676   :  { %1992 = vrcp.f32 %v557_v24 }
 0x679   :  { %v565_v25 = vpop.permute.xlu0 %564 }
 0x67a   :  { %v570_v26 = vsel %vm342_vm4, %v565_v25, 0 }
 0x67b   :  { %v1991_v27 = vpop.eup %1990  ;;  %1833 = vmatpush3.bf16.msra.mxu1 %v570_v26 }
 0x67c   :  { %v560_v28 = vmul.f32 %v1991_v27, %v1987_v19  ;;  %1844 = vmatprep.subr.bf16.mxu1 %v2040_v15 }
 0x67d   :  { %v756_v55 = vpop.permute.xlu0 %755 }
 0x67e   :  { %v562_v29 = vpack.c.bf16 %v560_v28, %v560_v28 }
 0x680   :  { %1835 = vmatmul.mubr.msk.bf16.vlgmr.msra.gmra.mxu1 %vm214_vm2, %v562_v29 }
 0x681   :  { %1846 = vmatprep.mubr.msk.bf16.mxu1 %vm2041_vm1, %v2040_v15  ;;  %1845 = vmatpush3.bf16.msra.mxu1 %v667_v41 }
 0x682   :  { %1856 = vmatprep.subr.bf16.mxu1 %v2040_v15 }
 0x683   :  { %v1993_v30 = vpop.eup %1992 }
 0x684   :  { %v561_v32 = vmul.f32 %v1993_v30, %v1989_v21 }
 0x686   :  { %v563_v33 = vpack.c.bf16 %v561_v32, %v561_v32 }
 0x688   :  { %1841 = vmatmul.mubr.msk.bf16.vlgmr.msra.gmra.mxu0 %vm214_vm2, %v563_v33 }
 0x689   :  { %1851 = vmatpush3.bf16.msra.mxu0 %v713_v34  ;;  %1852 = vmatprep.mubr.msk.bf16.mxu0 %vm2041_vm1, %v2040_v15 }
 0x68a   :  { %1862 = vmatprep.subr.bf16.mxu0 %v2040_v15 }
 0x690   :  { %1853 = vmatmul.mubr.msk.bf16.vlgmr.msra.gmra.mxu0 %vm214_vm2, %v434_v52 }
 0x691   :  { %1863 = vmatpush3.bf16.xpose.msra.mxu0 %v813_v37  ;;  %1864 = vmatprep.mubr.msk.bf16.mxu0 %vm2041_vm1, %v2040_v15 }
 0x692   :  { %1874 = vmatprep.subr.bf16.mxu0 %v2040_v15 }
 0x698   :  { %1865 = vmatmul.mubr.msk.bf16.vlgmr.msra.gmra.mxu0 %vm214_vm2, %v806_v39 }
 0x699   :  { %1876 = vmatprep.mubr.msk.bf16.mxu0 %vm2041_vm1, %v2040_v15 }
 0x740   :  { %v606_v43 = vpop.f32.mrf.mxu1 }
 0x742   :  { %v1836_v44 = vpop.f32.mrf.mxu1 }
 0x744   :  { %v609_v45 = vpop.f32.mrf.mxu1 }
 0x746   :  { %v1837_v46 = vpop.f32.mrf.mxu1 }
 0x748   :  { %v654_v47 = vpop.f32.mrf.mxu0 }
 0x749   :  { %v660_v48 = vpack.c.bf16 %v654_v47, %v606_v43 }
 0x74a   :  { %v1842_v49 = vpop.f32.mrf.mxu0 }
 0x74b   :  { %1847 = vmatmul.mubr.msk.bf16.vlgmr.msra.gmra.mxu1 %vm214_vm2, %v660_v48 }
 0x74c   :  { %1857 = vmatpush3.bf16.xpose.msra.mxu1 %v763_v51  ;;  %v657_v52 = vpop.f32.mrf.mxu0  ;;  %1858 = vmatprep.mubr.msk.bf16.mxu1 %vm2041_vm1, %v2040_v15  ;;  %v1706_v51 = vld [vmem:[%s2489_s6 + $0x8] sm:$0xf] }
 0x74d   :  { %1868 = vmatprep.subr.bf16.mxu1 %v2040_v15  ;;  %v986_v52 = vsel %vm342_vm4, %v1706_v51, 0 }
 0x74e   :  { %v1843_v53 = vpop.f32.mrf.mxu0 }
 0x750   :  { %v2309_v54 = vpop.f32.mrf.mxu0 }
 0x752   :  { %v1854_v56 = vpop.f32.mrf.mxu0 }
 0x753   :  { %1859 = vmatmul.mubr.msk.bf16.vlgmr.msra.gmra.mxu1 %vm214_vm2, %v756_v55 }
 0x754   :  { %v752_v59 = vpop.f32.mrf.mxu0  ;;  %1870 = vmatprep.mubr.msk.bf16.mxu1 %vm2041_vm1, %v2040_v15 }
 0x756   :  { %v1855_v60 = vpop.f32.mrf.mxu0 }
 0x758   :  { %v849_v61 = vpop.f32.mrf.mxu0 }
 0x759   :  { %v856_v62 = vsel %vm2205_vm3, %v849_v61, -10000.0 }
 0x75a   :  { %v858_v63 = vadd.f32 %v856_v62, %v2215_v6  ;;  %v1866_v2 = vpop.f32.mrf.mxu0 }
 0x75c   :  { %v852_v3 = vpop.f32.mrf.mxu0  ;;  %v862_v4 = vsel %vm214_vm2, %v858_v63, -inf }
 0x75d   :  { %863 = vmax.xlane.f32.xlu1 %v862_v4 }
 0x75e   :  { %v1867_v5 = vpop.f32.mrf.mxu0 }
 0x76e   :  { %931 = vrot.lane.b32.xlu1 %v2181_v42, %s2050_s17 }
 0x772   :  { %1031 = vrot.lane.b32.xlu1 %v2177_v38, %s2051_s18 }
 0x776   :  { %1081 = vrot.lane.b32.xlu1 %v2181_v42, %s2051_s18 }
 0x77a   :  { %1079 = vrot.lane.b32.xlu1 %v2181_v42, %s2052_s19 }
 0x7e6   :  { %v864_v7 = vpop.xlane.xlu1 %863 }
 0x7e7   :  { %v866_v10 = vsub.f32 %v858_v63, %v864_v7 }
 0x7e9   :  { %v869_v11 = vmul.f32 1.442695, %v866_v10 }
 0x7ea   :  { %v932_v8 = vpop.permute.xlu1 %931 }
 0x7eb   :  { %v937_v9 = vsel %vm342_vm4, %v932_v8, 0  ;;  %1994 = vpow2.f32 %v869_v11 }
 0x7ec   :  { %1875 = vmatpush3.bf16.msra.mxu0 %v937_v9 }
 0x7ed   :  { %1886 = vmatprep.subr.bf16.mxu0 %v2040_v15 }
 0x7ee   :  { %v1032_v34 = vpop.permute.xlu1 %1031 }
 0x7ef   :  { %v1037_v36 = vsel %vm214_vm2, %v1032_v34, 0 }
 0x7f2   :  { %v1082_v63 = vpop.permute.xlu1 %1081 }
 0x7f3   :  { %v1087_v5 = vsel %vm214_vm2, %v1082_v63, 0 }
 0x7f6   :  { %v1080_v8 = vpop.permute.xlu1 %1079 }
 0x7f8   :  { %v1995_v23 = vpop.eup %1994 }
 0x7f9   :  { %v874_v25 = vsel %vm214_vm2, %v1995_v23, 0.0 }
 0x80b   :  { %v2326_v12 = vpop.f32.mrf.mxu1 }
 0x80d   :  { %v1848_v13 = vpop.f32.mrf.mxu1 }
 0x80f   :  { %v706_v14 = vpop.f32.mrf.mxu1 }
 0x811   :  { %v1849_v16 = vpop.f32.mrf.mxu1 }
 0x812   :  { %v750_v16 = vadd.f32 %v2309_v54, %v2326_v12 }
 0x813   :  { %v799_v17 = vpop.f32.mrf.mxu1 }
 0x814   :  { %v855_v18 = vsel %vm2205_vm3, %v799_v17, -10000.0 }
 0x815   :  { %v857_v19 = vadd.f32 %v855_v18, %v2209_v58  ;;  %v1860_v20 = vpop.f32.mrf.mxu1 }
 0x817   :  { %v802_v21 = vpop.f32.mrf.mxu1  ;;  %v859_v22 = vsel %vm214_vm2, %v857_v19, -inf }
 0x818   :  { %860 = vmax.xlane.f32.xlu0 %v859_v22 }
 0x819   :  { %v1861_v24 = vpop.f32.mrf.mxu1 }
 0x81c   :  { %875 = vadd.xlane.f32.xlu0 %v874_v25 }
 0x8a1   :  { %v861_v26 = vpop.xlane.xlu0 %860 }
 0x8a2   :  { %v865_v27 = vsub.f32 %v857_v19, %v861_v26 }
 0x8a4   :  { %v867_v28 = vmul.f32 1.442695, %v865_v27 }
 0x8a5   :  { %v876_v29 = vpop.xlane.xlu0 %875 }
 0x8a6   :  { %1996 = vpow2.f32 %v867_v28 }
 0x8a7   :  { %1998 = vrcp.f32 %v876_v29 }
 0x8b3   :  { %v1997_v30 = vpop.eup %1996 }
 0x8b4   :  { %v1999_v31 = vpop.eup %1998  ;;  %v871_v32 = vsel %vm214_vm2, %v1997_v30, 0.0 }
 0x8b5   :  { %872 = vadd.xlane.f32.xlu0 %v871_v32  ;;  %v880_v33 = vmul.f32 %v1999_v31, %v1995_v23 }
 0x8b7   :  { %v882_v35 = vpack.c.bf16 %v880_v33, %v880_v33 }
 0x8b9   :  { %1877 = vmatmul.mubr.msk.bf16.vlgmr.msra.gmra.mxu0 %vm214_vm2, %v882_v35 }
 0x8ba   :  { %1887 = vmatpush3.bf16.xpose.msra.mxu0 %v1037_v36  ;;  %1888 = vmatprep.mubr.msk.bf16.mxu0 %vm2041_vm1, %v2040_v15 }
 0x8bb   :  { %1898 = vmatprep.subr.bf16.mxu0 %v2040_v15 }
 0x8cb   :  { %883 = vrot.lane.b32.xlu0 %v2177_v38, %s2050_s17 }
 0x8cf   :  { %1029 = vrot.lane.b32.xlu0 %v2177_v38, %s2052_s19 }
 0x93e   :  { %v873_v37 = vpop.xlane.xlu0 %872 }
 0x93f   :  { %2000 = vrcp.f32 %v873_v37 }
 0x942   :  { %v884_v39 = vpop.permute.xlu0 %883 }
 0x943   :  { %v889_v40 = vsel %vm342_vm4, %v884_v39, 0 }
 0x944   :  { %1869 = vmatpush3.bf16.msra.mxu1 %v889_v40 }
 0x945   :  { %1880 = vmatprep.subr.bf16.mxu1 %v2040_v15 }
 0x946   :  { %v1030_v41 = vpop.permute.xlu0 %1029 }
 0x947   :  { %1889 = vmatmul.mubr.msk.bf16.vlgmr.msra.gmra.mxu0 %vm214_vm2, %v1030_v41  ;;  %v1712_v41 = vld [vmem:[%s2489_s6 + $0xc] sm:$0xf] }
 0x948   :  { %1900 = vmatprep.mubr.msk.bf16.mxu0 %vm2041_vm1, %v2040_v15 }
 0x94c   :  { %v2001_v43 = vpop.eup %2000 }
 0x94d   :  { %v879_v44 = vmul.f32 %v2001_v43, %v1997_v30  ;;  %v1260_v43 = vsel %vm342_vm4, %v1712_v41, 0 }
 0x94f   :  { %v881_v45 = vpack.c.bf16 %v879_v44, %v879_v44 }
 0x951   :  { %1871 = vmatmul.mubr.msk.bf16.vlgmr.msra.gmra.mxu1 %vm214_vm2, %v881_v45 }
 0x952   :  { %1882 = vmatprep.mubr.msk.bf16.mxu1 %vm2041_vm1, %v2040_v15  ;;  %1881 = vmatpush3.bf16.msra.mxu1 %v986_v52 }
 0x953   :  { %1892 = vmatprep.subr.bf16.mxu1 %v2040_v15 }
 0x979   :  { %v973_v46 = vpop.f32.mrf.mxu0 }
 0x97b   :  { %v1878_v47 = vpop.f32.mrf.mxu0 }
 0x97d   :  { %v976_v48 = vpop.f32.mrf.mxu0 }
 0x97f   :  { %v1879_v49 = vpop.f32.mrf.mxu0 }
 0xa07   :  { %v1073_v53 = vpop.f32.mrf.mxu0 }
 0xa08   :  { %v1129_v55 = vsel %vm2205_vm3, %v1073_v53, -10000.0 }
 0xa09   :  { %v1131_v56 = vadd.f32 %v1129_v55, %v2209_v58  ;;  %v1890_v59 = vpop.f32.mrf.mxu0 }
 0xa0b   :  { %v1076_v60 = vpop.f32.mrf.mxu0  ;;  %v1133_v61 = vsel %vm214_vm2, %v1131_v56, -inf }
 0xa0c   :  { %1134 = vmax.xlane.f32.xlu0 %v1133_v61 }
 0xa0d   :  { %v1891_v62 = vpop.f32.mrf.mxu0 }
 0xa11   :  { %v925_v2 = vpop.f32.mrf.mxu1 }
 0xa12   :  { %v979_v3 = vpack.c.bf16 %v973_v46, %v925_v2 }
 0xa13   :  { %v1872_v4 = vpop.f32.mrf.mxu1 }
 0xa14   :  { %1883 = vmatmul.mubr.msk.bf16.vlgmr.msra.gmra.mxu1 %vm214_vm2, %v979_v3 }
 0xa15   :  { %1893 = vmatpush3.bf16.xpose.msra.mxu1 %v1087_v5  ;;  %v928_v7 = vpop.f32.mrf.mxu1  ;;  %1894 = vmatprep.mubr.msk.bf16.mxu1 %vm2041_vm1, %v2040_v15 }
 0xa16   :  { %1904 = vmatprep.subr.bf16.mxu1 %v2040_v15 }
 0xa17   :  { %v1873_v58 = vpop.f32.mrf.mxu1 }
 0xa1c   :  { %1895 = vmatmul.mubr.msk.bf16.vlgmr.msra.gmra.mxu1 %vm214_vm2, %v1080_v8 }
 0xa1d   :  { %1906 = vmatprep.mubr.msk.bf16.mxu1 %vm2041_vm1, %v2040_v15 }
 0xa95   :  { %v1135_v9 = vpop.xlane.xlu0 %1134 }
 0xa96   :  { %v1139_v10 = vsub.f32 %v1131_v56, %v1135_v9  ;;  %v1714_v56 = vld [vmem:[%s2490_s7] ss:$0 sm:$0xff] }
 0xa98   :  { %v1141_v11 = vmul.f32 1.442695, %v1139_v10 }
 0xa9a   :  { %2002 = vpow2.f32 %v1141_v11 }
 0xaa7   :  { %v2003_v13 = vpop.eup %2002 }
 0xaa8   :  { %v1145_v14 = vsel %vm214_vm2, %v2003_v13, 0.0 }
 0xaa9   :  { %1146 = vadd.xlane.f32.xlu0 %v1145_v14 }
 0xad4   :  { %v1022_v17 = vpop.f32.mrf.mxu1 }
 0xad5   :  { %v1028_v18 = vadd.f32 %v1022_v17, %v750_v16  ;;  %v1964_v16 = vld [vmem:[%s2493_s10 + $0x8] sm:$0xff]   ;;  %v1965_v17 = vld [vmem:[%s2493_s10] sm:$0xff]  }
 0xad6   :  { %v1884_v19 = vpop.f32.mrf.mxu1 }
 0xad8   :  { %v1025_v20 = vpop.f32.mrf.mxu1 }
 0xada   :  { %v1885_v21 = vpop.f32.mrf.mxu1 }
 0xadc   :  { %v1123_v22 = vpop.f32.mrf.mxu1 }
 0xadd   :  { %v1130_v23 = vsel %vm2205_vm3, %v1123_v22, -10000.0 }
 0xade   :  { %v1132_v24 = vadd.f32 %v1130_v23, %v2215_v6  ;;  %v1896_v25 = vpop.f32.mrf.mxu1 }
 0xadf   :  { %v1715_v25 = vld [vmem:[%s2491_s8] ss:$0 sm:$0xff] }
 0xae0   :  { %v1126_v26 = vpop.f32.mrf.mxu1  ;;  %v1136_v27 = vsel %vm214_vm2, %v1132_v24, -inf }
 0xae1   :  { %1137 = vmax.xlane.f32.xlu1 %v1136_v27 }
 0xae2   :  { %v1897_v28 = vpop.f32.mrf.mxu1 }
 0xaf2   :  { %1205 = vrot.lane.b32.xlu1 %v2181_v42, %s2053_s21 }
 0xb32   :  { %v1147_v32 = vpop.xlane.xlu0 %1146 }
 0xb6a   :  { %v1138_v54 = vpop.xlane.xlu1 %1137 }
 0xb6b   :  { %v1140_v12 = vsub.f32 %v1132_v24, %v1138_v54  ;;  %v1716_v54 = vld [vmem:[%s2492_s9] ss:$0 sm:$0xff] }
 0xb6d   :  { %v1143_v29 = vmul.f32 1.442695, %v1140_v12 }
 0xb6e   :  { %v1206_v30 = vpop.permute.xlu1 %1205 }
 0xb6f   :  { %2004 = vpow2.f32 %v1143_v29  ;;  %v1211_v31 = vsel %vm342_vm4, %v1206_v30, 0 }
 0xb70   :  { %1905 = vmatpush3.bf16.msra.mxu1 %v1211_v31  ;;  %2006 = vrcp.f32 %v1147_v32  ;;  %v1967_v32 = vld [vmem:[%s2495_s12 + $0x30] sm:$0xff]  }
 0xb71   :  { %1916 = vmatprep.subr.bf16.mxu1 %v2040_v15 }
 0xb7c   :  { %v2005_v57 = vpop.eup %2004 }
 0xb7d   :  { %v1148_v6 = vsel %vm214_vm2, %v2005_v57, 0.0  ;;  %v2007_v33 = vpop.eup %2006 }
 0xb7e   :  { %1149 = vadd.xlane.f32.xlu0 %v1148_v6  ;;  %v1153_v34 = vmul.f32 %v2007_v33, %v2003_v13  ;;  %v1966_v6 = vld [vmem:[%s2495_s12 + $0x38] sm:$0xff]   ;;  %v1968_v33 = vld [vmem:[%s2495_s12 + $0x28] sm:$0xff]  }
 0xb80   :  { %v1155_v37 = vpack.c.bf16 %v1153_v34, %v1153_v34  ;;  %v1970_v34 = vld [vmem:[%s2495_s12 + $0x18] sm:$0xff]  }
 0xb94   :  { %1157 = vrot.lane.b32.xlu0 %v2177_v38, %s2053_s21 }
 0xc07   :  { %v1150_v42 = vpop.xlane.xlu0 %1149 }
 0xc08   :  { %2008 = vrcp.f32 %v1150_v42  ;;  %v1969_v42 = vld [vmem:[%s2495_s12 + $0x20] sm:$0xff]  }
 0xc0b   :  { %v1158_v35 = vpop.permute.xlu0 %1157 }
 0xc0c   :  { %v1163_v36 = vsel %vm342_vm4, %v1158_v35, 0  ;;  %v1971_v35 = vld [vmem:[%s2495_s12 + $0x10] sm:$0xff]  }
 0xc0d   :  { %1899 = vmatpush3.bf16.msra.mxu0 %v1163_v36  ;;  %v1972_v36 = vld [vmem:[%s2495_s12 + $0x8] sm:$0xff]  }
 0xc0e   :  { %1910 = vmatprep.subr.bf16.mxu0 %v2040_v15 }
 0xc10   :  { %1901 = vmatmul.mubr.msk.bf16.vlgmr.msra.gmra.mxu0 %vm214_vm2, %v1155_v37  ;;  %v1973_v37 = vld [vmem:[%s2495_s12] sm:$0xff]  }
 0xc11   :  { %1912 = vmatprep.mubr.msk.bf16.mxu0 %vm2041_vm1, %v2040_v15  ;;  %1911 = vmatpush3.bf16.msra.mxu0 %v1260_v43 }
 0xc12   :  { %1924 = vmatprep.subr.bf16.mxu0 %v2040_v15 }
 0xc15   :  { %v2009_v39 = vpop.eup %2008 }
 0xc16   :  { %v1154_v38 = vmul.f32 %v2009_v39, %v2005_v57  ;;  %v1717_v39 = vld [vmem:[%s2494_s11] ss:$0 sm:$0xff] }
 0xc18   :  { %v1156_v40 = vpack.c.bf16 %v1154_v38, %v1154_v38 }
 0xc1a   :  { %1907 = vmatmul.mubr.msk.bf16.vlgmr.msra.gmra.mxu1 %vm214_vm2, %v1156_v40 }
 0xc1b   :  { %1920 = vmatprep.mubr.msk.bf16.mxu1 %vm2041_vm1, %v2040_v15  ;;  %1917 = vmatpush3.bf16.msra.mxu1 %v1964_v16 }
 0xc1c   :  { %1918 = vmatprep.subr.bf16.mxu1 %v2040_v15 }
 0xc1f   :  { %1919 = vmatpush3.bf16.msra.mxu1 %v1965_v17 }
 0xcd0   :  { %v1199_v44 = vpop.f32.mrf.mxu0 }
 0xcd2   :  { %v1902_v45 = vpop.f32.mrf.mxu0 }
 0xcd4   :  { %v1202_v46 = vpop.f32.mrf.mxu0 }
 0xcd6   :  { %v1903_v47 = vpop.f32.mrf.mxu0 }
 0xcda   :  { %v1247_v48 = vpop.f32.mrf.mxu1 }
 0xcdb   :  { %v1253_v49 = vpack.c.bf16 %v1247_v48, %v1199_v44 }
 0xcdc   :  { %v1908_v51 = vpop.f32.mrf.mxu1 }
 0xcdd   :  { %1913 = vmatmul.mubr.msk.bf16.vlgmr.msra.gmra.mxu0 %vm214_vm2, %v1253_v49 }
 0xcde   :  { %v1250_v52 = vpop.f32.mrf.mxu1  ;;  %1940 = vmatprep.mubr.msk.bf16.mxu0 %vm2041_vm1, %v2040_v15  ;;  %1925 = vmatpush3.bf16.msra.mxu0 %v1966_v6 }
 0xcdf   :  { %1926 = vmatprep.subr.bf16.mxu0 %v2040_v15 }
 0xce0   :  { %v1909_v53 = vpop.f32.mrf.mxu1 }
 0xce2   :  { %1927 = vmatpush3.bf16.msra.mxu0 %v1967_v32 }
 0xce3   :  { %1928 = vmatprep.subr.bf16.mxu0 %v2040_v15 }
 0xce6   :  { %1929 = vmatpush3.bf16.msra.mxu0 %v1968_v33 }
 0xce7   :  { %1930 = vmatprep.subr.bf16.mxu0 %v2040_v15 }
 0xcea   :  { %1931 = vmatpush3.bf16.msra.mxu0 %v1969_v42 }
 0xceb   :  { %1932 = vmatprep.subr.bf16.mxu0 %v2040_v15 }
 0xcee   :  { %1933 = vmatpush3.bf16.msra.mxu0 %v1970_v34 }
 0xcef   :  { %1934 = vmatprep.subr.bf16.mxu0 %v2040_v15 }
 0xcf2   :  { %1935 = vmatpush3.bf16.msra.mxu0 %v1971_v35 }
 0xcf3   :  { %1936 = vmatprep.subr.bf16.mxu0 %v2040_v15 }
 0xcf6   :  { %1937 = vmatpush3.bf16.msra.mxu0 %v1972_v36 }
 0xcf7   :  { %1938 = vmatprep.subr.bf16.mxu0 %v2040_v15 }
 0xcfa   :  { %1939 = vmatpush3.bf16.msra.mxu0 %v1973_v37 }
 0xd9d   :  { %v1296_v55 = vpop.f32.mrf.mxu0 }
 0xd9e   :  { %v1302_v59 = vadd.f32 %v1296_v55, %v1028_v18 }
 0xd9f   :  { %v1914_v60 = vpop.f32.mrf.mxu0 }
 0xda0   :  { %v1310_v61 = vadd.f32 %v1714_v56, %v1302_v59 }
 0xda1   :  { %v1299_v62 = vpop.f32.mrf.mxu0 }
 0xda2   :  { %v2400_v63 = vadd.f32 %v1310_v61, %v2136_v0  ;;  %v2403_v2 = vadd.f32 %v1310_v61, %v2141_v1 }
 0xda3   :  { %v1915_v3 = vpop.f32.mrf.mxu0 }
 0xda4   :  { %v1318_v4 = vsel %vm53_vm0, %v2403_v2, 0.0  ;;  %v1315_v5 = vsel %vm53_vm0, %v2400_v63, 0.0 }
 0xda5   :  { %1319 = vadd.xlane.f32.xlu0 %v1318_v4  ;;  %1316 = vadd.xlane.f32.xlu1 %v1315_v5 }
 0xe2e   :  { %v1320_v7 = vpop.xlane.xlu0 %1319  ;;  %v1317_v58 = vpop.xlane.xlu1 %1316 }
 0xe2f   :  { %v1322_v8 = vmul.f32 0.03125, %v1320_v7  ;;  %v1321_v9 = vmul.f32 0.03125, %v1317_v58 }
 0xe31   :  { %v1324_v10 = vsub.f32 %v2403_v2, %v1322_v8  ;;  %v1323_v0 = vsub.f32 %v2400_v63, %v1321_v9  ;;  %v2054_v9 = vmov 1983009808  }
 0xe33   :  { %v1326_v11 = vmul.f32 %v1324_v10, %v1324_v10  ;;  %v1325_v1 = vmul.f32 %v1323_v0, %v1323_v0 }
 0xe35   :  { %v1330_v13 = vsel %vm53_vm0, %v1326_v11, 0.0  ;;  %v1327_v14 = vsel %vm53_vm0, %v1325_v1, 0.0 }
 0xe36   :  { %1331 = vadd.xlane.f32.xlu1 %v1330_v13  ;;  %1328 = vadd.xlane.f32.xlu0 %v1327_v14  ;;  %v2055_v14 = vmov 1934713408  }
 0xe37   :  { %v1591_v16 = vunpack.c.l.s4 %v2055_v14 }
 0xebf   :  { %v1329_v18 = vpop.xlane.xlu0 %1328  ;;  %v1332_v19 = vpop.xlane.xlu1 %1331 }
 0xec0   :  { %v1333_v20 = vmul.f32 0.03125, %v1329_v18  ;;  %v1334_v21 = vmul.f32 0.03125, %v1332_v19 }
 0xec2   :  { %v1335_v22 = vadd.f32 1e-05, %v1333_v20  ;;  %v1336_v23 = vadd.f32 1e-05, %v1334_v21 }
 0xec4   :  { %2010 = vrsqrt.f32 %v1335_v22  ;;  %v1592_v22 = vunpack.c.0.s8 %v1591_v16 }
 0xec5   :  { %2012 = vrsqrt.f32 %v1336_v23 }
 0xed1   :  { %v2011_v24 = vpop.eup %2010 }
 0xed2   :  { %v2013_v26 = vpop.eup %2012  ;;  %v1339_v27 = vmul.f32 %v2011_v24, %v1323_v0  ;;  %v1721_v0 = vld [vmem:[%s2496_s13] ss:$0 sm:$0xff]  ;;  %s2056_s13 = smov 32  }
 0xed3   :  { %v1340_v28 = vmul.f32 %v2013_v26, %v1324_v10  ;;  %v1560_v10 = vunpack.c.l.s4 %v2054_v9 }
 0xed4   :  { %v1347_v12 = vmul.f32 %v1715_v25, %v1339_v27 }
 0xed5   :  { %v1348_v29 = vmul.f32 %v1715_v25, %v1340_v28  ;;  %v1561_v13 = vunpack.c.0.s8 %v1560_v10 }
 0xed6   :  { %v1355_v30 = vadd.f32 %v1716_v54, %v1347_v12 }
 0xed7   :  { %v1356_v31 = vadd.f32 %v1716_v54, %v1348_v29  ;;  %v1564_v20 = vsub.s32 %v1561_v13, %v2197_v50  ;;  %v1595_v54 = vsub.s32 %v1592_v22, %v2197_v50 }
 0xed9   :  { %v1357_v57 = vpack.c.bf16 %v1356_v31, %v1355_v30 }
 0xedb   :  { %1921 = vmatmul.mubr.msk.bf16.vlgmr.msra.gmra.mxu1 %vm53_vm0, %v1357_v57 }
 0xf9b   :  { %v1418_v38 = vpop.f32.mrf.mxu1 }
 0xf9c   :  { %v1419_v40 = vadd.f32 %v1717_v39, %v1418_v38 }
 0xf9d   :  { %v1922_v41 = vpop.f32.mrf.mxu1 }
 0xf9e   :  { %v1425_v43 = vmul.f32 %v1419_v40, %v1419_v40 }
 0xf9f   :  { %v1421_v44 = vpop.f32.mrf.mxu1 }
 0xfa0   :  { %v1427_v45 = vmul.f32 %v1425_v43, %v1419_v40  ;;  %v1422_v46 = vadd.f32 %v1717_v39, %v1421_v44 }
 0xfa1   :  { %v1923_v47 = vpop.f32.mrf.mxu1 }
 0xfa2   :  { %v1429_v48 = vmul.f32 0.044715, %v1427_v45  ;;  %v1426_v49 = vmul.f32 %v1422_v46, %v1422_v46 }
 0xfa4   :  { %v1431_v51 = vadd.f32 %v1429_v48, %v1419_v40  ;;  %v1428_v52 = vmul.f32 %v1426_v49, %v1422_v46 }
 0xfa6   :  { %v1433_v53 = vmul.f32 0.7978846, %v1431_v51  ;;  %v1430_v55 = vmul.f32 0.044715, %v1428_v52 }
 0xfa8   :  { %2014 = vtanh.f32 %v1433_v53  ;;  %v1432_v56 = vadd.f32 %v1430_v55, %v1422_v46 }
 0xfaa   :  { %v1434_v59 = vmul.f32 0.7978846, %v1432_v56 }
 0xfac   :  { %2016 = vtanh.f32 %v1434_v59 }
 0xfb5   :  { %v2015_v60 = vpop.eup %2014 }
 0xfb6   :  { %v1437_v61 = vadd.f32 1.0, %v2015_v60 }
 0xfb8   :  { %v1439_v3 = vmul.f32 0.5, %v1437_v61 }
 0xfb9   :  { %v2017_v62 = vpop.eup %2016 }
 0xfba   :  { %v1438_v4 = vadd.f32 1.0, %v2017_v62  ;;  %v1441_v7 = vmul.f32 %v1439_v3, %v1419_v40 }
 0xfbc   :  { %v1440_v5 = vmul.f32 0.5, %v1438_v4 }
 0xfbe   :  { %v1442_v58 = vmul.f32 %v1440_v5, %v1422_v46 }
 0xfc0   :  { %v1443_v8 = vpack.c.bf16 %v1442_v58, %v1441_v7 }
 0xfc2   :  { %1941 = vmatmul.mubr.bf16.vlgmr.msra.gmra.mxu0 %v1443_v8 }
0x1082   :  { %v1549_v11 = vpop.f32.mrf.mxu0 }
0x1083   :  { %v1550_v1 = vadd.f32 %v1721_v0, %v1549_v11 }
0x1084   :  { %v1942_v17 = vpop.f32.mrf.mxu0 }
0x1085   :  { %v1556_v18 = vadd.f32 %v1550_v1, %v2400_v63 }
0x1086   :  { %v1552_v19 = vpop.f32.mrf.mxu0 }
0x1087   :  { %v1553_v21 = vadd.f32 %v1721_v0, %v1552_v19  ;;  %v1558_v24 = vcombine.high %v1556_v18, %v2040_v15  ;;  %v1565_v26 = vrot.slane %v1556_v18, %v1564_v20 }
0x1088   :  { %v1943_v23 = vpop.f32.mrf.mxu0 }
0x1089   :  { %v1557_v25 = vadd.f32 %v1553_v21, %v2403_v2  ;;  %v1572_v12 = vrot.slane %v1558_v24, %v1564_v20 }
0x108b   :  { %v1573_v27 = vcombine.high %v1557_v25, %v2040_v15  ;;  %v1580_v28 = vrot.slane %v1557_v25, %v1564_v20 }
0x108d   :  { %v1587_v29 = vrot.slane %v1573_v27, %v1564_v20  ;;  %v1588_v30 = vcombine.low %v1565_v26, %v1580_v28  ;;  %v1589_v63 = vcombine.high %v1565_v26, %v1580_v28 }
0x108f   :  { %v1603_v31 = vrot.slane %v1589_v63, %v1595_v54  ;;  %v1596_v57 = vrot.slane %v1588_v30, %v1595_v54  ;;  %v1605_v6 = vcombine.high %v1572_v12, %v1587_v29  ;;  %v1604_v32 = vcombine.low %v1572_v12, %v1587_v29 }
0x1091   :  { %1629 = vrot.lane.b32.xlu1 %v1603_v31, %s2044_s1  ;;  %v1620_v33 = vcombine.high %v1596_v57, %v2040_v15  ;;  %v1619_v2 = vrot.slane %v1605_v6, %v1595_v54  ;;  %v1612_v42 = vrot.slane %v1604_v32, %v1595_v54  ;;  %v1621_v50 = vcombine.high %v1603_v31, %v2040_v15 }
0x1093   :  { %1625 = vrot.lane.b32.xlu0 %v1620_v33, %s2056_s13  ;;  %v1622_v34 = vcombine.high %v1612_v42, %v2040_v15  ;;  %v1623_v35 = vcombine.high %v1619_v2, %v2040_v15 }
0x1095   :  { %1641 = vrot.lane.b32.xlu1 %v1619_v2, %s2044_s1  ;;  %s2057_s1 = smov [#allocation2]  }
0x1096   :  { %s1674_s3 = sshll.u32 %s2057_s1, 4  ;;  %s1675_s3 = int_to_ptr.vmem [resolvable:$true] %s1674_s3 }
0x1097   :  { %1633 = vrot.lane.b32.xlu0 %v1621_v50, %s2042_s2  ;;  %p2023_p1 = scmp.lt.s32.totalorder %s1675_s3, %s1675_s3 }
0x1099   :  { %1637 = vrot.lane.b32.xlu1 %v1622_v34, %s2056_s13 }
0x109d   :  { %1645 = vrot.lane.b32.xlu1 %v1623_v35, %s2042_s2  ;;  %s2018_s2 = scalar_lea.vmem %s1675_s3, 64 }
0x109e   :  { %p2019_p0 = scmp.ne.s32.totalorder %s1675_s3, %s2018_s2  ;;  %p2024_p2 = scmp.lt.s32.totalorder %s2018_s2, %s2018_s2 }
0x10a0   :  { %p2025_p3 = por %p2024_p2, %p2023_p1 }
0x10a2   :  { %p2026_p4 = pnand %p2025_p3, %p2019_p0 }
0x1103   :  { %v1630_v36 = vpop.permute.xlu1 %1629 }
0x1105   :  { %v1626_v37 = vpop.permute.xlu0 %1625 }
0x1106   :  { %v1648_v40 = vsel %vm53_vm0, %v1596_v57, %v1626_v37 }
0x1107   :  { %v1642_v39 = vpop.permute.xlu1 %1641  ;;  %v1650_v44 = vsel %vm1649_vm5, %v1648_v40, %v1630_v36 }
0x1109   :  { %v1634_v43 = vpop.permute.xlu0 %1633 }
0x110a   :  { %v1652_v47 = vsel %vm1651_vm6, %v1650_v44, %v1634_v43 }
0x110b   :  { %v1638_v38 = vpop.permute.xlu1 %1637 }
0x110c   :  { %v1653_v41 = vsel %vm53_vm0, %v1612_v42, %v1638_v38 }
0x110d   :  { %v1654_v45 = vsel %vm1649_vm5, %v1653_v41, %v1642_v39 }
0x110f   :  { %v1646_v46 = vpop.permute.xlu1 %1645 }
0x1110   :  { %v1655_v15 = vsel %vm1651_vm6, %v1654_v45, %v1646_v46 }
0x1111   :  { %v1658_v48 = vcombine.low %v1652_v47, %v1655_v15 }
0x1113   :  { %1730 = vst.sshfl [vmem:[#allocation2] sm:$0x33 pattern:$0x76325410] %v1658_v48 }
0x1114   :  { %2029 = shalt.err (!%p2026_p4)
}
0x1115   :  { %1677 = dma.vmem_to_hbm [thread:$0]  %s1675_s3, 64, %s2497_s14, [#allocation3]  }
0x1116   :  { %2038 = dma.done.wait [#allocation3], 64  }
0x1117   :  { %2039 = vsyncadd [#allocation3], 4294967232 }
0x1118   :  { %1681 = vsyncpa [#allocation3], 1 }

</bundles_post_ra>
